<compile_context>
chip_gen: v7x
topology: tpu7x:2x2x1
jax: 0.10.0
libtpu: 0.0.40
codegen_flags: <defaults>
</compile_context>

<pallas_src>
import functools

import jax
import jax.numpy as jnp
from jax.experimental import pallas as pl
from jax.experimental.pallas import tpu as pltpu

EPS = 1e-5


def _tap_masks(H, W, L):
    """Boolean (1, L) masks, one per 3x3 tap k = (dy+1)*3 + (dx+1).

    L = bt * H * W lanes; lane q = n*H*W + y*W + x.  mask[k][0, q] is True iff
    the source pixel (y+dy, x+dx) of output position q lies inside image n
    (zero padding otherwise, which also kills cross-image bleed).
    """
    S = H * W
    idx = jax.lax.broadcasted_iota(jnp.int32, (1, L), 1)
    if (W & (W - 1)) == 0 and (H & (H - 1)) == 0:   # power-of-two dims: bit ops
        col = jnp.bitwise_and(idx, W - 1)
        row = jnp.bitwise_and(jnp.right_shift(idx, W.bit_length() - 1), H - 1)
    else:
        col = idx % W
        row = (idx // W) % H
    masks = []
    for k in range(9):
        dy, dx = k // 3 - 1, k % 3 - 1
        ys, xs = row + dy, col + dx
        masks.append((ys >= 0) & (ys < H) & (xs >= 0) & (xs < W))
    return masks


def _conv3x3(act, w_ref, buf_ref, patches_ref, masks, W):
    """3x3 'same' conv as one MXU matmul: (Cout, 9*Cin) x (9*Cin, bt*H*W).

    act:   (Cin, L) activation, L = bt*H*W on the lane axis.
    w_ref: (Cout, 9*Cin) folded weights, column index = k*Cin + ci.
    """
    cin, L = act.shape
    P = W + 1                                    # interior offset in row buffer
    # Stage the activation once; the 9 shifted windows are plain static slices.
    buf_ref[0:cin, P:P + L] = act
    for k in range(9):
        dy, dx = k // 3 - 1, k % 3 - 1
        start = P + dy * W + dx                  # in [0, 2*(W+1)], always in bounds
        win = buf_ref[0:cin, start:start + L]    # (Cin, L) shifted window
        # Select (not multiply) so uninitialised / stale border values never leak.
        patches_ref[k * cin:(k + 1) * cin, :] = jnp.where(masks[k], win, 0.0)
    return jnp.dot(w_ref[...], patches_ref[0:9 * cin, :],
                   preferred_element_type=jnp.float32)


def toynet2d_kernel(x_ref, w1_ref, b1_ref, w2_ref, b2_ref, w3_ref, pool_ref,
                    o_ref, buf_ref, patches_ref, *, H, W):
    L = x_ref.shape[2]                # bt * H * W
    masks = _tap_masks(H, W, L)       # cheap VPU work, once per grid step

    x = x_ref[0]                                                    # (Cin, L)

    # conv1 (no bias) + BN1 (folded, eval mode) + ReLU
    h1 = _conv3x3(x, w1_ref, buf_ref, patches_ref, masks, W)
    h1 = jnp.maximum(h1 + b1_ref[...], 0.0)                         # (c1, L)

    # conv2 (no bias) + BN2 (folded, eval mode) + ReLU
    h2 = _conv3x3(h1, w2_ref, buf_ref, patches_ref, masks, W)
    h2 = jnp.maximum(h2 + b2_ref[...], 0.0)                         # (c2, L)

    # conv3 (no bias, no BN)
    logits = _conv3x3(h2, w3_ref, buf_ref, patches_ref, masks, W)   # (ncls, L)

    # per-image spatial mean via one tiny MXU matmul, then softmax over classes
    avg = jnp.dot(logits, pool_ref[...],
                  preferred_element_type=jnp.float32)               # (ncls, bt)
    m = jnp.max(avg, axis=0, keepdims=True)
    e = jnp.exp(avg - m)
    probs = e / jnp.sum(e, axis=0, keepdims=True)                   # (ncls, bt)
    o_ref[...] = probs[None]                                        # (1, ncls, bt)


def _fold_params(params):
    """PyTorch-layout parameters -> MXU-friendly folded kernel parameters."""
    def conv_mat(w_oihw, scale=None):
        co, ci = w_oihw.shape[0], w_oihw.shape[1]
        if scale is not None:
            w_oihw = w_oihw * scale[:, None, None, None]
        # (Cout, Cin, ky, kx) -> (Cout, ky, kx, Cin) -> (Cout, 9*Cin)
        return jnp.transpose(w_oihw, (0, 2, 3, 1)).reshape(co, 9 * ci)

    s1 = params['bn1_gamma'] / jnp.sqrt(params['bn1_var'] + EPS)
    b1 = (params['bn1_beta'] - params['bn1_mean'] * s1)[:, None]
    s2 = params['bn2_gamma'] / jnp.sqrt(params['bn2_var'] + EPS)
    b2 = (params['bn2_beta'] - params['bn2_mean'] * s2)[:, None]
    return (conv_mat(params['w1'], s1), b1.astype(jnp.float32),
            conv_mat(params['w2'], s2), b2.astype(jnp.float32),
            conv_mat(params['w3']))


def toynet2d_forward(x_nchw, params, *, batch_tile=8):
    """x_nchw: (N, Cin, H, W) float32 (PyTorch layout). Returns (N, num_classes)."""
    N, Cin, H, W = x_nchw.shape
    S = H * W
    w1f, b1, w2f, b2, w3f = _fold_params(params)
    c1, c2, ncls = w1f.shape[0], w2f.shape[0], w3f.shape[0]
    cmax = max(Cin, c1, c2)

    bt = max(1, min(N, batch_tile))           # images packed per grid step
    n_tiles = -(-N // bt)
    Npad = n_tiles * bt
    L = bt * S

    # Flatten spatial dims onto the lane axis and pack bt images per tile:
    # (n_tiles, Cin, bt*S) with lane index q = n*S + y*W + x.  Host-side
    # reshape/transpose is layout plumbing only.
    x = x_nchw.reshape(N, Cin, S).astype(jnp.float32)
    if Npad != N:
        x = jnp.concatenate(
            [x, jnp.zeros((Npad - N, Cin, S), jnp.float32)], axis=0)
    x_packed = (x.reshape(n_tiles, bt, Cin, S)
                 .transpose(0, 2, 1, 3)
                 .reshape(n_tiles, Cin, L))

    # Per-image mean-pooling matrix: pool[q, n] = 1/S iff lane q belongs to image n.
    pool = jnp.repeat(jnp.eye(bt, dtype=jnp.float32), S, axis=0) / float(S)  # (L, bt)

    kernel = functools.partial(toynet2d_kernel, H=H, W=W)
    out = pl.pallas_call(
        kernel,
        out_shape=jax.ShapeDtypeStruct((n_tiles, ncls, bt), jnp.float32),
        grid_spec=pltpu.PrefetchScalarGridSpec(
            num_scalar_prefetch=0,
            grid=(n_tiles,),
            in_specs=[
                pl.BlockSpec((1, Cin, L), lambda t: (t, 0, 0)),
                pl.BlockSpec((c1, 9 * Cin), lambda t: (0, 0)),
                pl.BlockSpec((c1, 1), lambda t: (0, 0)),
                pl.BlockSpec((c2, 9 * c1), lambda t: (0, 0)),
                pl.BlockSpec((c2, 1), lambda t: (0, 0)),
                pl.BlockSpec((ncls, 9 * c2), lambda t: (0, 0)),
                pl.BlockSpec((L, bt), lambda t: (0, 0)),
            ],
            out_specs=pl.BlockSpec((1, ncls, bt), lambda t: (t, 0, 0)),
            scratch_shapes=[
                pltpu.VMEM((cmax, L + 2 * (W + 1)), jnp.float32),   # padded row buffer
                pltpu.VMEM((9 * cmax, L), jnp.float32),             # im2col patches
            ],
        ),
        compiler_params=pltpu.CompilerParams(
            dimension_semantics=("parallel",)),   # batch tiles across TensorCores
    )(x_packed, w1f, b1, w2f, b2, w3f, pool)

    # (n_tiles, ncls, bt) -> (Npad, ncls) -> (N, ncls)
    probs = out.transpose(0, 2, 1).reshape(Npad, ncls)[:N]
    return probs


def init_params(key, input_channels=1, num_classes=2):
    """Deterministic synthetic parameters matching ToyNet2d.__init__ shapes
    (PyTorch layouts: Conv2d weight (Cout, Cin, 3, 3); BatchNorm2d per-channel)."""
    ks = jax.random.split(key, 11)

    def conv_w(k, cout, cin):
        return 0.1 * jax.random.normal(k, (cout, cin, 3, 3), jnp.float32)

    return {
        'w1': conv_w(ks[0], 8, input_channels),
        'bn1_gamma': 1.0 + 0.1 * jax.random.normal(ks[1], (8,), jnp.float32),
        'bn1_beta': 0.1 * jax.random.normal(ks[2], (8,), jnp.float32),
        'bn1_mean': 0.05 * jax.random.normal(ks[3], (8,), jnp.float32),
        'bn1_var': 1.0 + 0.1 * jax.random.uniform(ks[4], (8,), jnp.float32),
        'w2': conv_w(ks[5], 8, 8),
        'bn2_gamma': 1.0 + 0.1 * jax.random.normal(ks[6], (8,), jnp.float32),
        'bn2_beta': 0.1 * jax.random.normal(ks[7], (8,), jnp.float32),
        'bn2_mean': 0.05 * jax.random.normal(ks[8], (8,), jnp.float32),
        'bn2_var': 1.0 + 0.1 * jax.random.uniform(ks[9], (8,), jnp.float32),
        'w3': conv_w(ks[10], num_classes, 8),
    }


def toynet2d_reference(x_nchw, params):
    """Pure-JAX reference (no Pallas), eval-mode BatchNorm."""
    x = jnp.transpose(x_nchw, (0, 2, 3, 1)).astype(jnp.float32)      # NHWC

    def conv(h, w_oihw):
        k = jnp.transpose(w_oihw, (2, 3, 1, 0))                      # HWIO
        return jax.lax.conv_general_dilated(
            h, k, (1, 1), 'SAME', dimension_numbers=('NHWC', 'HWIO', 'NHWC'))

    def bn(h, g, b, m, v):
        return (h - m) * (g / jnp.sqrt(v + EPS)) + b

    h = jax.nn.relu(bn(conv(x, params['w1']), params['bn1_gamma'],
                       params['bn1_beta'], params['bn1_mean'], params['bn1_var']))
    h = jax.nn.relu(bn(conv(h, params['w2']), params['bn2_gamma'],
                       params['bn2_beta'], params['bn2_mean'], params['bn2_var']))
    logits = conv(h, params['w3'])
    avg = jnp.mean(logits, axis=(1, 2))                              # (N, ncls)
    return jax.nn.softmax(avg, axis=-1)


if __name__ == "__main__":
    key = jax.random.PRNGKey(0)
    k_x, k_p, k_x2, k_p2 = jax.random.split(key, 4)

    # ToyNet2d defaults: input_channels=1, num_classes=2
    N, Cin, H, W = 2, 1, 16, 16
    x = jax.random.normal(k_x, (N, Cin, H, W), jnp.float32)
    params = init_params(k_p, input_channels=Cin, num_classes=2)

    probs = jax.block_until_ready(toynet2d_forward(x, params))
    ref = jax.block_until_ready(toynet2d_reference(x, params))

    assert probs.shape == (N, 2)
    assert bool(jnp.all(jnp.isfinite(probs)))
    assert bool(jnp.allclose(jnp.sum(probs, axis=1), 1.0, atol=1e-5))
    assert bool(jnp.allclose(probs, ref, atol=1e-5, rtol=1e-5))

    # Secondary check: multi-channel input, >2 classes, ragged batch that
    # exercises batch padding and a multi-step grid.
    N2, Cin2, ncls2 = 5, 3, 4
    x2 = jax.random.normal(k_x2, (N2, Cin2, H, W), jnp.float32)
    params2 = init_params(k_p2, input_channels=Cin2, num_classes=ncls2)
    probs2 = jax.block_until_ready(toynet2d_forward(x2, params2, batch_tile=2))
    ref2 = jax.block_until_ready(toynet2d_reference(x2, params2))
    assert probs2.shape == (N2, ncls2)
    assert bool(jnp.allclose(probs2, ref2, atol=1e-5, rtol=1e-5))

    print("KERNEL_OK")
</pallas_src>

<mosaic_0001>
module attributes {stable_mosaic.version = 11 : i64} {
  func.func @toynet2d_kernel(%arg0: i32, %arg1: memref<1x1x512xf32, #tpu.memory_space<vmem>>, %arg2: memref<8x9xf32, #tpu.memory_space<vmem>>, %arg3: memref<8x1xf32, #tpu.memory_space<vmem>>, %arg4: memref<8x72xf32, #tpu.memory_space<vmem>>, %arg5: memref<8x1xf32, #tpu.memory_space<vmem>>, %arg6: memref<2x72xf32, #tpu.memory_space<vmem>>, %arg7: memref<512x2xf32, #tpu.memory_space<vmem>>, %arg8: memref<1x2x2xf32, #tpu.memory_space<vmem>>, %arg9: memref<8x546xf32, #tpu.memory_space<vmem>>, %arg10: memref<72x512xf32, #tpu.memory_space<vmem>>) attributes {dimension_semantics = [#tpu.dimension_semantics<parallel>], iteration_bounds = array<i64: 1>, scalar_prefetch = 0 : i64, scratch_operands = 2 : i64, tpu.core_type = #tpu.core_type<tc>, window_params = [{transform_indices = @transform_0, window_bounds = array<i64: 1, 1, 512>}, {pipeline_mode = #tpu.pipeline_mode<synchronous>, transform_indices = @transform_1, window_bounds = array<i64: 8, 9>}, {pipeline_mode = #tpu.pipeline_mode<synchronous>, transform_indices = @transform_2, window_bounds = array<i64: 8, 1>}, {pipeline_mode = #tpu.pipeline_mode<synchronous>, transform_indices = @transform_3, window_bounds = array<i64: 8, 72>}, {pipeline_mode = #tpu.pipeline_mode<synchronous>, transform_indices = @transform_4, window_bounds = array<i64: 8, 1>}, {pipeline_mode = #tpu.pipeline_mode<synchronous>, transform_indices = @transform_5, window_bounds = array<i64: 2, 72>}, {pipeline_mode = #tpu.pipeline_mode<synchronous>, transform_indices = @transform_6, window_bounds = array<i64: 512, 2>}, {transform_indices = @transform_7, window_bounds = array<i64: 1, 2, 2>}]} {
    %0 = tpu.iota {dimensions = array<i32: 1>} : vector<1x512xi32>
    %c15_i32 = arith.constant 15 : i32
    %1 = vector.broadcast %c15_i32 : i32 to vector<1x512xi32>
    %2 = arith.andi %0, %1 : vector<1x512xi32>
    %c4_i32 = arith.constant 4 : i32
    %3 = vector.broadcast %c4_i32 : i32 to vector<1x512xi32>
    %4 = arith.shrsi %0, %3 : vector<1x512xi32>
    %c15_i32_0 = arith.constant 15 : i32
    %5 = vector.broadcast %c15_i32_0 : i32 to vector<1x512xi32>
    %6 = arith.andi %4, %5 : vector<1x512xi32>
    %c-1_i32 = arith.constant -1 : i32
    %7 = vector.broadcast %c-1_i32 : i32 to vector<1x512xi32>
    %8 = arith.addi %6, %7 : vector<1x512xi32>
    %c-1_i32_1 = arith.constant -1 : i32
    %9 = vector.broadcast %c-1_i32_1 : i32 to vector<1x512xi32>
    %10 = arith.addi %2, %9 : vector<1x512xi32>
    %c0_i32 = arith.constant 0 : i32
    %11 = vector.broadcast %c0_i32 : i32 to vector<1x512xi32>
    %12 = arith.cmpi sge, %8, %11 : vector<1x512xi32>
    %c16_i32 = arith.constant 16 : i32
    %13 = vector.broadcast %c16_i32 : i32 to vector<1x512xi32>
    %14 = arith.cmpi slt, %8, %13 : vector<1x512xi32>
    %15 = arith.andi %12, %14 : vector<1x512xi1>
    %c0_i32_2 = arith.constant 0 : i32
    %16 = vector.broadcast %c0_i32_2 : i32 to vector<1x512xi32>
    %17 = arith.cmpi sge, %10, %16 : vector<1x512xi32>
    %18 = arith.andi %15, %17 : vector<1x512xi1>
    %c16_i32_3 = arith.constant 16 : i32
    %19 = vector.broadcast %c16_i32_3 : i32 to vector<1x512xi32>
    %20 = arith.cmpi slt, %10, %19 : vector<1x512xi32>
    %21 = arith.andi %18, %20 : vector<1x512xi1>
    %c-1_i32_4 = arith.constant -1 : i32
    %22 = vector.broadcast %c-1_i32_4 : i32 to vector<1x512xi32>
    %23 = arith.addi %6, %22 : vector<1x512xi32>
    %c0_i32_5 = arith.constant 0 : i32
    %24 = vector.broadcast %c0_i32_5 : i32 to vector<1x512xi32>
    %25 = arith.addi %2, %24 : vector<1x512xi32>
    %c0_i32_6 = arith.constant 0 : i32
    %26 = vector.broadcast %c0_i32_6 : i32 to vector<1x512xi32>
    %27 = arith.cmpi sge, %23, %26 : vector<1x512xi32>
    %c16_i32_7 = arith.constant 16 : i32
    %28 = vector.broadcast %c16_i32_7 : i32 to vector<1x512xi32>
    %29 = arith.cmpi slt, %23, %28 : vector<1x512xi32>
    %30 = arith.andi %27, %29 : vector<1x512xi1>
    %c0_i32_8 = arith.constant 0 : i32
    %31 = vector.broadcast %c0_i32_8 : i32 to vector<1x512xi32>
    %32 = arith.cmpi sge, %25, %31 : vector<1x512xi32>
    %33 = arith.andi %30, %32 : vector<1x512xi1>
    %c16_i32_9 = arith.constant 16 : i32
    %34 = vector.broadcast %c16_i32_9 : i32 to vector<1x512xi32>
    %35 = arith.cmpi slt, %25, %34 : vector<1x512xi32>
    %36 = arith.andi %33, %35 : vector<1x512xi1>
    %c-1_i32_10 = arith.constant -1 : i32
    %37 = vector.broadcast %c-1_i32_10 : i32 to vector<1x512xi32>
    %38 = arith.addi %6, %37 : vector<1x512xi32>
    %c1_i32 = arith.constant 1 : i32
    %39 = vector.broadcast %c1_i32 : i32 to vector<1x512xi32>
    %40 = arith.addi %2, %39 : vector<1x512xi32>
    %c0_i32_11 = arith.constant 0 : i32
    %41 = vector.broadcast %c0_i32_11 : i32 to vector<1x512xi32>
    %42 = arith.cmpi sge, %38, %41 : vector<1x512xi32>
    %c16_i32_12 = arith.constant 16 : i32
    %43 = vector.broadcast %c16_i32_12 : i32 to vector<1x512xi32>
    %44 = arith.cmpi slt, %38, %43 : vector<1x512xi32>
    %45 = arith.andi %42, %44 : vector<1x512xi1>
    %c0_i32_13 = arith.constant 0 : i32
    %46 = vector.broadcast %c0_i32_13 : i32 to vector<1x512xi32>
    %47 = arith.cmpi sge, %40, %46 : vector<1x512xi32>
    %48 = arith.andi %45, %47 : vector<1x512xi1>
    %c16_i32_14 = arith.constant 16 : i32
    %49 = vector.broadcast %c16_i32_14 : i32 to vector<1x512xi32>
    %50 = arith.cmpi slt, %40, %49 : vector<1x512xi32>
    %51 = arith.andi %48, %50 : vector<1x512xi1>
    %c0_i32_15 = arith.constant 0 : i32
    %52 = vector.broadcast %c0_i32_15 : i32 to vector<1x512xi32>
    %53 = arith.addi %6, %52 : vector<1x512xi32>
    %c-1_i32_16 = arith.constant -1 : i32
    %54 = vector.broadcast %c-1_i32_16 : i32 to vector<1x512xi32>
    %55 = arith.addi %2, %54 : vector<1x512xi32>
    %c0_i32_17 = arith.constant 0 : i32
    %56 = vector.broadcast %c0_i32_17 : i32 to vector<1x512xi32>
    %57 = arith.cmpi sge, %53, %56 : vector<1x512xi32>
    %c16_i32_18 = arith.constant 16 : i32
    %58 = vector.broadcast %c16_i32_18 : i32 to vector<1x512xi32>
    %59 = arith.cmpi slt, %53, %58 : vector<1x512xi32>
    %60 = arith.andi %57, %59 : vector<1x512xi1>
    %c0_i32_19 = arith.constant 0 : i32
    %61 = vector.broadcast %c0_i32_19 : i32 to vector<1x512xi32>
    %62 = arith.cmpi sge, %55, %61 : vector<1x512xi32>
    %63 = arith.andi %60, %62 : vector<1x512xi1>
    %c16_i32_20 = arith.constant 16 : i32
    %64 = vector.broadcast %c16_i32_20 : i32 to vector<1x512xi32>
    %65 = arith.cmpi slt, %55, %64 : vector<1x512xi32>
    %66 = arith.andi %63, %65 : vector<1x512xi1>
    %c0_i32_21 = arith.constant 0 : i32
    %67 = vector.broadcast %c0_i32_21 : i32 to vector<1x512xi32>
    %68 = arith.addi %6, %67 : vector<1x512xi32>
    %c0_i32_22 = arith.constant 0 : i32
    %69 = vector.broadcast %c0_i32_22 : i32 to vector<1x512xi32>
    %70 = arith.addi %2, %69 : vector<1x512xi32>
    %c0_i32_23 = arith.constant 0 : i32
    %71 = vector.broadcast %c0_i32_23 : i32 to vector<1x512xi32>
    %72 = arith.cmpi sge, %68, %71 : vector<1x512xi32>
    %c16_i32_24 = arith.constant 16 : i32
    %73 = vector.broadcast %c16_i32_24 : i32 to vector<1x512xi32>
    %74 = arith.cmpi slt, %68, %73 : vector<1x512xi32>
    %75 = arith.andi %72, %74 : vector<1x512xi1>
    %c0_i32_25 = arith.constant 0 : i32
    %76 = vector.broadcast %c0_i32_25 : i32 to vector<1x512xi32>
    %77 = arith.cmpi sge, %70, %76 : vector<1x512xi32>
    %78 = arith.andi %75, %77 : vector<1x512xi1>
    %c16_i32_26 = arith.constant 16 : i32
    %79 = vector.broadcast %c16_i32_26 : i32 to vector<1x512xi32>
    %80 = arith.cmpi slt, %70, %79 : vector<1x512xi32>
    %81 = arith.andi %78, %80 : vector<1x512xi1>
    %c0_i32_27 = arith.constant 0 : i32
    %82 = vector.broadcast %c0_i32_27 : i32 to vector<1x512xi32>
    %83 = arith.addi %6, %82 : vector<1x512xi32>
    %c1_i32_28 = arith.constant 1 : i32
    %84 = vector.broadcast %c1_i32_28 : i32 to vector<1x512xi32>
    %85 = arith.addi %2, %84 : vector<1x512xi32>
    %c0_i32_29 = arith.constant 0 : i32
    %86 = vector.broadcast %c0_i32_29 : i32 to vector<1x512xi32>
    %87 = arith.cmpi sge, %83, %86 : vector<1x512xi32>
    %c16_i32_30 = arith.constant 16 : i32
    %88 = vector.broadcast %c16_i32_30 : i32 to vector<1x512xi32>
    %89 = arith.cmpi slt, %83, %88 : vector<1x512xi32>
    %90 = arith.andi %87, %89 : vector<1x512xi1>
    %c0_i32_31 = arith.constant 0 : i32
    %91 = vector.broadcast %c0_i32_31 : i32 to vector<1x512xi32>
    %92 = arith.cmpi sge, %85, %91 : vector<1x512xi32>
    %93 = arith.andi %90, %92 : vector<1x512xi1>
    %c16_i32_32 = arith.constant 16 : i32
    %94 = vector.broadcast %c16_i32_32 : i32 to vector<1x512xi32>
    %95 = arith.cmpi slt, %85, %94 : vector<1x512xi32>
    %96 = arith.andi %93, %95 : vector<1x512xi1>
    %c1_i32_33 = arith.constant 1 : i32
    %97 = vector.broadcast %c1_i32_33 : i32 to vector<1x512xi32>
    %98 = arith.addi %6, %97 : vector<1x512xi32>
    %c-1_i32_34 = arith.constant -1 : i32
    %99 = vector.broadcast %c-1_i32_34 : i32 to vector<1x512xi32>
    %100 = arith.addi %2, %99 : vector<1x512xi32>
    %c0_i32_35 = arith.constant 0 : i32
    %101 = vector.broadcast %c0_i32_35 : i32 to vector<1x512xi32>
    %102 = arith.cmpi sge, %98, %101 : vector<1x512xi32>
    %c16_i32_36 = arith.constant 16 : i32
    %103 = vector.broadcast %c16_i32_36 : i32 to vector<1x512xi32>
    %104 = arith.cmpi slt, %98, %103 : vector<1x512xi32>
    %105 = arith.andi %102, %104 : vector<1x512xi1>
    %c0_i32_37 = arith.constant 0 : i32
    %106 = vector.broadcast %c0_i32_37 : i32 to vector<1x512xi32>
    %107 = arith.cmpi sge, %100, %106 : vector<1x512xi32>
    %108 = arith.andi %105, %107 : vector<1x512xi1>
    %c16_i32_38 = arith.constant 16 : i32
    %109 = vector.broadcast %c16_i32_38 : i32 to vector<1x512xi32>
    %110 = arith.cmpi slt, %100, %109 : vector<1x512xi32>
    %111 = arith.andi %108, %110 : vector<1x512xi1>
    %c1_i32_39 = arith.constant 1 : i32
    %112 = vector.broadcast %c1_i32_39 : i32 to vector<1x512xi32>
    %113 = arith.addi %6, %112 : vector<1x512xi32>
    %c0_i32_40 = arith.constant 0 : i32
    %114 = vector.broadcast %c0_i32_40 : i32 to vector<1x512xi32>
    %115 = arith.addi %2, %114 : vector<1x512xi32>
    %c0_i32_41 = arith.constant 0 : i32
    %116 = vector.broadcast %c0_i32_41 : i32 to vector<1x512xi32>
    %117 = arith.cmpi sge, %113, %116 : vector<1x512xi32>
    %c16_i32_42 = arith.constant 16 : i32
    %118 = vector.broadcast %c16_i32_42 : i32 to vector<1x512xi32>
    %119 = arith.cmpi slt, %113, %118 : vector<1x512xi32>
    %120 = arith.andi %117, %119 : vector<1x512xi1>
    %c0_i32_43 = arith.constant 0 : i32
    %121 = vector.broadcast %c0_i32_43 : i32 to vector<1x512xi32>
    %122 = arith.cmpi sge, %115, %121 : vector<1x512xi32>
    %123 = arith.andi %120, %122 : vector<1x512xi1>
    %c16_i32_44 = arith.constant 16 : i32
    %124 = vector.broadcast %c16_i32_44 : i32 to vector<1x512xi32>
    %125 = arith.cmpi slt, %115, %124 : vector<1x512xi32>
    %126 = arith.andi %123, %125 : vector<1x512xi1>
    %c1_i32_45 = arith.constant 1 : i32
    %127 = vector.broadcast %c1_i32_45 : i32 to vector<1x512xi32>
    %128 = arith.addi %6, %127 : vector<1x512xi32>
    %c1_i32_46 = arith.constant 1 : i32
    %129 = vector.broadcast %c1_i32_46 : i32 to vector<1x512xi32>
    %130 = arith.addi %2, %129 : vector<1x512xi32>
    %c0_i32_47 = arith.constant 0 : i32
    %131 = vector.broadcast %c0_i32_47 : i32 to vector<1x512xi32>
    %132 = arith.cmpi sge, %128, %131 : vector<1x512xi32>
    %c16_i32_48 = arith.constant 16 : i32
    %133 = vector.broadcast %c16_i32_48 : i32 to vector<1x512xi32>
    %134 = arith.cmpi slt, %128, %133 : vector<1x512xi32>
    %135 = arith.andi %132, %134 : vector<1x512xi1>
    %c0_i32_49 = arith.constant 0 : i32
    %136 = vector.broadcast %c0_i32_49 : i32 to vector<1x512xi32>
    %137 = arith.cmpi sge, %130, %136 : vector<1x512xi32>
    %138 = arith.andi %135, %137 : vector<1x512xi1>
    %c16_i32_50 = arith.constant 16 : i32
    %139 = vector.broadcast %c16_i32_50 : i32 to vector<1x512xi32>
    %140 = arith.cmpi slt, %130, %139 : vector<1x512xi32>
    %141 = arith.andi %138, %140 : vector<1x512xi1>
    %c0 = arith.constant 0 : index
    %c0_51 = arith.constant 0 : index
    %c0_52 = arith.constant 0 : index
    %142 = vector.load %arg1[%c0, %c0_51, %c0_52] : memref<1x1x512xf32, #tpu.memory_space<vmem>>, vector<1x1x512xf32>
    %143 = vector.shape_cast %142 : vector<1x1x512xf32> to vector<1x512xf32>
    %c0_53 = arith.constant 0 : index
    %c17 = arith.constant 17 : index
    %144 = vector.load %arg9[%c0_53, %c17] : memref<8x546xf32, #tpu.memory_space<vmem>>, vector<1x512xf32>
    tpu.vector_store %arg9[%c0_53, %c17], %143 {strides = array<i32>} : memref<8x546xf32, #tpu.memory_space<vmem>>, vector<1x512xf32>,
    %c0_54 = arith.constant 0 : index
    %c0_55 = arith.constant 0 : index
    %145 = vector.load %arg9[%c0_54, %c0_55] : memref<8x546xf32, #tpu.memory_space<vmem>>, vector<1x512xf32>
    %cst = arith.constant 0.000000e+00 : f32
    %146 = vector.broadcast %cst : f32 to vector<1x512xf32>
    %147 = arith.select %21, %145, %146 : vector<1x512xi1>, vector<1x512xf32>
    %c0_56 = arith.constant 0 : index
    %c0_57 = arith.constant 0 : index
    %148 = vector.load %arg10[%c0_56, %c0_57] : memref<72x512xf32, #tpu.memory_space<vmem>>, vector<1x512xf32>
    tpu.vector_store %arg10[%c0_56, %c0_57], %147 {strides = array<i32>} : memref<72x512xf32, #tpu.memory_space<vmem>>, vector<1x512xf32>,
    %c0_58 = arith.constant 0 : index
    %c1 = arith.constant 1 : index
    %149 = vector.load %arg9[%c0_58, %c1] : memref<8x546xf32, #tpu.memory_space<vmem>>, vector<1x512xf32>
    %cst_59 = arith.constant 0.000000e+00 : f32
    %150 = vector.broadcast %cst_59 : f32 to vector<1x512xf32>
    %151 = arith.select %36, %149, %150 : vector<1x512xi1>, vector<1x512xf32>
    %c1_60 = arith.constant 1 : index
    %c0_61 = arith.constant 0 : index
    %152 = vector.load %arg10[%c1_60, %c0_61] : memref<72x512xf32, #tpu.memory_space<vmem>>, vector<1x512xf32>
    tpu.vector_store %arg10[%c1_60, %c0_61], %151 {strides = array<i32>} : memref<72x512xf32, #tpu.memory_space<vmem>>, vector<1x512xf32>,
    %c0_62 = arith.constant 0 : index
    %c2 = arith.constant 2 : index
    %153 = vector.load %arg9[%c0_62, %c2] : memref<8x546xf32, #tpu.memory_space<vmem>>, vector<1x512xf32>
    %cst_63 = arith.constant 0.000000e+00 : f32
    %154 = vector.broadcast %cst_63 : f32 to vector<1x512xf32>
    %155 = arith.select %51, %153, %154 : vector<1x512xi1>, vector<1x512xf32>
    %c2_64 = arith.constant 2 : index
    %c0_65 = arith.constant 0 : index
    %156 = vector.load %arg10[%c2_64, %c0_65] : memref<72x512xf32, #tpu.memory_space<vmem>>, vector<1x512xf32>
    tpu.vector_store %arg10[%c2_64, %c0_65], %155 {strides = array<i32>} : memref<72x512xf32, #tpu.memory_space<vmem>>, vector<1x512xf32>,
    %c0_66 = arith.constant 0 : index
    %c16 = arith.constant 16 : index
    %157 = vector.load %arg9[%c0_66, %c16] : memref<8x546xf32, #tpu.memory_space<vmem>>, vector<1x512xf32>
    %cst_67 = arith.constant 0.000000e+00 : f32
    %158 = vector.broadcast %cst_67 : f32 to vector<1x512xf32>
    %159 = arith.select %66, %157, %158 : vector<1x512xi1>, vector<1x512xf32>
    %c3 = arith.constant 3 : index
    %c0_68 = arith.constant 0 : index
    %160 = vector.load %arg10[%c3, %c0_68] : memref<72x512xf32, #tpu.memory_space<vmem>>, vector<1x512xf32>
    tpu.vector_store %arg10[%c3, %c0_68], %159 {strides = array<i32>} : memref<72x512xf32, #tpu.memory_space<vmem>>, vector<1x512xf32>,
    %c0_69 = arith.constant 0 : index
    %c17_70 = arith.constant 17 : index
    %161 = vector.load %arg9[%c0_69, %c17_70] : memref<8x546xf32, #tpu.memory_space<vmem>>, vector<1x512xf32>
    %cst_71 = arith.constant 0.000000e+00 : f32
    %162 = vector.broadcast %cst_71 : f32 to vector<1x512xf32>
    %163 = arith.select %81, %161, %162 : vector<1x512xi1>, vector<1x512xf32>
    %c4 = arith.constant 4 : index
    %c0_72 = arith.constant 0 : index
    %164 = vector.load %arg10[%c4, %c0_72] : memref<72x512xf32, #tpu.memory_space<vmem>>, vector<1x512xf32>
    tpu.vector_store %arg10[%c4, %c0_72], %163 {strides = array<i32>} : memref<72x512xf32, #tpu.memory_space<vmem>>, vector<1x512xf32>,
    %c0_73 = arith.constant 0 : index
    %c18 = arith.constant 18 : index
    %165 = vector.load %arg9[%c0_73, %c18] : memref<8x546xf32, #tpu.memory_space<vmem>>, vector<1x512xf32>
    %cst_74 = arith.constant 0.000000e+00 : f32
    %166 = vector.broadcast %cst_74 : f32 to vector<1x512xf32>
    %167 = arith.select %96, %165, %166 : vector<1x512xi1>, vector<1x512xf32>
    %c5 = arith.constant 5 : index
    %c0_75 = arith.constant 0 : index
    %168 = vector.load %arg10[%c5, %c0_75] : memref<72x512xf32, #tpu.memory_space<vmem>>, vector<1x512xf32>
    tpu.vector_store %arg10[%c5, %c0_75], %167 {strides = array<i32>} : memref<72x512xf32, #tpu.memory_space<vmem>>, vector<1x512xf32>,
    %c0_76 = arith.constant 0 : index
    %c32 = arith.constant 32 : index
    %169 = vector.load %arg9[%c0_76, %c32] : memref<8x546xf32, #tpu.memory_space<vmem>>, vector<1x512xf32>
    %cst_77 = arith.constant 0.000000e+00 : f32
    %170 = vector.broadcast %cst_77 : f32 to vector<1x512xf32>
    %171 = arith.select %111, %169, %170 : vector<1x512xi1>, vector<1x512xf32>
    %c6 = arith.constant 6 : index
    %c0_78 = arith.constant 0 : index
    %172 = vector.load %arg10[%c6, %c0_78] : memref<72x512xf32, #tpu.memory_space<vmem>>, vector<1x512xf32>
    tpu.vector_store %arg10[%c6, %c0_78], %171 {strides = array<i32>} : memref<72x512xf32, #tpu.memory_space<vmem>>, vector<1x512xf32>,
    %c0_79 = arith.constant 0 : index
    %c33 = arith.constant 33 : index
    %173 = vector.load %arg9[%c0_79, %c33] : memref<8x546xf32, #tpu.memory_space<vmem>>, vector<1x512xf32>
    %cst_80 = arith.constant 0.000000e+00 : f32
    %174 = vector.broadcast %cst_80 : f32 to vector<1x512xf32>
    %175 = arith.select %126, %173, %174 : vector<1x512xi1>, vector<1x512xf32>
    %c7 = arith.constant 7 : index
    %c0_81 = arith.constant 0 : index
    %176 = vector.load %arg10[%c7, %c0_81] : memref<72x512xf32, #tpu.memory_space<vmem>>, vector<1x512xf32>
    tpu.vector_store %arg10[%c7, %c0_81], %175 {strides = array<i32>} : memref<72x512xf32, #tpu.memory_space<vmem>>, vector<1x512xf32>,
    %c0_82 = arith.constant 0 : index
    %c34 = arith.constant 34 : index
    %177 = vector.load %arg9[%c0_82, %c34] : memref<8x546xf32, #tpu.memory_space<vmem>>, vector<1x512xf32>
    %cst_83 = arith.constant 0.000000e+00 : f32
    %178 = vector.broadcast %cst_83 : f32 to vector<1x512xf32>
    %179 = arith.select %141, %177, %178 : vector<1x512xi1>, vector<1x512xf32>
    %c8 = arith.constant 8 : index
    %c0_84 = arith.constant 0 : index
    %180 = vector.load %arg10[%c8, %c0_84] : memref<72x512xf32, #tpu.memory_space<vmem>>, vector<1x512xf32>
    tpu.vector_store %arg10[%c8, %c0_84], %179 {strides = array<i32>} : memref<72x512xf32, #tpu.memory_space<vmem>>, vector<1x512xf32>,
    %c0_85 = arith.constant 0 : index
    %c0_86 = arith.constant 0 : index
    %181 = vector.load %arg2[%c0_85, %c0_86] : memref<8x9xf32, #tpu.memory_space<vmem>>, vector<8x9xf32>
    %c0_87 = arith.constant 0 : index
    %c0_88 = arith.constant 0 : index
    %182 = vector.load %arg10[%c0_87, %c0_88] : memref<72x512xf32, #tpu.memory_space<vmem>>, vector<9x512xf32>
    %cst_89 = arith.constant dense<0.000000e+00> : vector<8x512xf32>
    %183 = tpu.matmul %181, %182, %cst_89 {dimension_numbers = #tpu.dot_dimension_numbers<[1], [0], [0], [1], [0, 0, 1, 1], [], []>} : vector<8x9xf32>, vector<9x512xf32>, vector<8x512xf32> -> vector<8x512xf32>
    %c0_90 = arith.constant 0 : index
    %c0_91 = arith.constant 0 : index
    %184 = vector.load %arg3[%c0_90, %c0_91] : memref<8x1xf32, #tpu.memory_space<vmem>>, vector<8x1xf32>
    %185 = vector.broadcast %184 : vector<8x1xf32> to vector<8x512xf32>
    %186 = arith.addf %183, %185 : vector<8x512xf32>
    %cst_92 = arith.constant 0.000000e+00 : f32
    %187 = vector.broadcast %cst_92 : f32 to vector<8x512xf32>
    %188 = arith.maximumf %186, %187 : vector<8x512xf32>
    %c0_93 = arith.constant 0 : index
    %c17_94 = arith.constant 17 : index
    %189 = vector.load %arg9[%c0_93, %c17_94] : memref<8x546xf32, #tpu.memory_space<vmem>>, vector<8x512xf32>
    tpu.vector_store %arg9[%c0_93, %c17_94], %188 {strides = array<i32>} : memref<8x546xf32, #tpu.memory_space<vmem>>, vector<8x512xf32>,
    %c0_95 = arith.constant 0 : index
    %c0_96 = arith.constant 0 : index
    %190 = vector.load %arg9[%c0_95, %c0_96] : memref<8x546xf32, #tpu.memory_space<vmem>>, vector<8x512xf32>
    %cst_97 = arith.constant 0.000000e+00 : f32
    %191 = vector.shape_cast %21 : vector<1x512xi1> to vector<1x512xi1>
    %192 = vector.broadcast %191 : vector<1x512xi1> to vector<8x512xi1>
    %193 = vector.broadcast %cst_97 : f32 to vector<8x512xf32>
    %194 = arith.select %192, %190, %193 : vector<8x512xi1>, vector<8x512xf32>
    %c0_98 = arith.constant 0 : index
    %c0_99 = arith.constant 0 : index
    %195 = vector.load %arg10[%c0_98, %c0_99] : memref<72x512xf32, #tpu.memory_space<vmem>>, vector<8x512xf32>
    tpu.vector_store %arg10[%c0_98, %c0_99], %194 {strides = array<i32>} : memref<72x512xf32, #tpu.memory_space<vmem>>, vector<8x512xf32>,
    %c0_100 = arith.constant 0 : index
    %c1_101 = arith.constant 1 : index
    %196 = vector.load %arg9[%c0_100, %c1_101] : memref<8x546xf32, #tpu.memory_space<vmem>>, vector<8x512xf32>
    %cst_102 = arith.constant 0.000000e+00 : f32
    %197 = vector.shape_cast %36 : vector<1x512xi1> to vector<1x512xi1>
    %198 = vector.broadcast %197 : vector<1x512xi1> to vector<8x512xi1>
    %199 = vector.broadcast %cst_102 : f32 to vector<8x512xf32>
    %200 = arith.select %198, %196, %199 : vector<8x512xi1>, vector<8x512xf32>
    %c8_103 = arith.constant 8 : index
    %c0_104 = arith.constant 0 : index
    %201 = vector.load %arg10[%c8_103, %c0_104] : memref<72x512xf32, #tpu.memory_space<vmem>>, vector<8x512xf32>
    tpu.vector_store %arg10[%c8_103, %c0_104], %200 {strides = array<i32>} : memref<72x512xf32, #tpu.memory_space<vmem>>, vector<8x512xf32>,
    %c0_105 = arith.constant 0 : index
    %c2_106 = arith.constant 2 : index
    %202 = vector.load %arg9[%c0_105, %c2_106] : memref<8x546xf32, #tpu.memory_space<vmem>>, vector<8x512xf32>
    %cst_107 = arith.constant 0.000000e+00 : f32
    %203 = vector.shape_cast %51 : vector<1x512xi1> to vector<1x512xi1>
    %204 = vector.broadcast %203 : vector<1x512xi1> to vector<8x512xi1>
    %205 = vector.broadcast %cst_107 : f32 to vector<8x512xf32>
    %206 = arith.select %204, %202, %205 : vector<8x512xi1>, vector<8x512xf32>
    %c16_108 = arith.constant 16 : index
    %c0_109 = arith.constant 0 : index
    %207 = vector.load %arg10[%c16_108, %c0_109] : memref<72x512xf32, #tpu.memory_space<vmem>>, vector<8x512xf32>
    tpu.vector_store %arg10[%c16_108, %c0_109], %206 {strides = array<i32>} : memref<72x512xf32, #tpu.memory_space<vmem>>, vector<8x512xf32>,
    %c0_110 = arith.constant 0 : index
    %c16_111 = arith.constant 16 : index
    %208 = vector.load %arg9[%c0_110, %c16_111] : memref<8x546xf32, #tpu.memory_space<vmem>>, vector<8x512xf32>
    %cst_112 = arith.constant 0.000000e+00 : f32
    %209 = vector.shape_cast %66 : vector<1x512xi1> to vector<1x512xi1>
    %210 = vector.broadcast %209 : vector<1x512xi1> to vector<8x512xi1>
    %211 = vector.broadcast %cst_112 : f32 to vector<8x512xf32>
    %212 = arith.select %210, %208, %211 : vector<8x512xi1>, vector<8x512xf32>
    %c24 = arith.constant 24 : index
    %c0_113 = arith.constant 0 : index
    %213 = vector.load %arg10[%c24, %c0_113] : memref<72x512xf32, #tpu.memory_space<vmem>>, vector<8x512xf32>
    tpu.vector_store %arg10[%c24, %c0_113], %212 {strides = array<i32>} : memref<72x512xf32, #tpu.memory_space<vmem>>, vector<8x512xf32>,
    %c0_114 = arith.constant 0 : index
    %c17_115 = arith.constant 17 : index
    %214 = vector.load %arg9[%c0_114, %c17_115] : memref<8x546xf32, #tpu.memory_space<vmem>>, vector<8x512xf32>
    %cst_116 = arith.constant 0.000000e+00 : f32
    %215 = vector.shape_cast %81 : vector<1x512xi1> to vector<1x512xi1>
    %216 = vector.broadcast %215 : vector<1x512xi1> to vector<8x512xi1>
    %217 = vector.broadcast %cst_116 : f32 to vector<8x512xf32>
    %218 = arith.select %216, %214, %217 : vector<8x512xi1>, vector<8x512xf32>
    %c32_117 = arith.constant 32 : index
    %c0_118 = arith.constant 0 : index
    %219 = vector.load %arg10[%c32_117, %c0_118] : memref<72x512xf32, #tpu.memory_space<vmem>>, vector<8x512xf32>
    tpu.vector_store %arg10[%c32_117, %c0_118], %218 {strides = array<i32>} : memref<72x512xf32, #tpu.memory_space<vmem>>, vector<8x512xf32>,
    %c0_119 = arith.constant 0 : index
    %c18_120 = arith.constant 18 : index
    %220 = vector.load %arg9[%c0_119, %c18_120] : memref<8x546xf32, #tpu.memory_space<vmem>>, vector<8x512xf32>
    %cst_121 = arith.constant 0.000000e+00 : f32
    %221 = vector.shape_cast %96 : vector<1x512xi1> to vector<1x512xi1>
    %222 = vector.broadcast %221 : vector<1x512xi1> to vector<8x512xi1>
    %223 = vector.broadcast %cst_121 : f32 to vector<8x512xf32>
    %224 = arith.select %222, %220, %223 : vector<8x512xi1>, vector<8x512xf32>
    %c40 = arith.constant 40 : index
    %c0_122 = arith.constant 0 : index
    %225 = vector.load %arg10[%c40, %c0_122] : memref<72x512xf32, #tpu.memory_space<vmem>>, vector<8x512xf32>
    tpu.vector_store %arg10[%c40, %c0_122], %224 {strides = array<i32>} : memref<72x512xf32, #tpu.memory_space<vmem>>, vector<8x512xf32>,
    %c0_123 = arith.constant 0 : index
    %c32_124 = arith.constant 32 : index
    %226 = vector.load %arg9[%c0_123, %c32_124] : memref<8x546xf32, #tpu.memory_space<vmem>>, vector<8x512xf32>
    %cst_125 = arith.constant 0.000000e+00 : f32
    %227 = vector.shape_cast %111 : vector<1x512xi1> to vector<1x512xi1>
    %228 = vector.broadcast %227 : vector<1x512xi1> to vector<8x512xi1>
    %229 = vector.broadcast %cst_125 : f32 to vector<8x512xf32>
    %230 = arith.select %228, %226, %229 : vector<8x512xi1>, vector<8x512xf32>
    %c48 = arith.constant 48 : index
    %c0_126 = arith.constant 0 : index
    %231 = vector.load %arg10[%c48, %c0_126] : memref<72x512xf32, #tpu.memory_space<vmem>>, vector<8x512xf32>
    tpu.vector_store %arg10[%c48, %c0_126], %230 {strides = array<i32>} : memref<72x512xf32, #tpu.memory_space<vmem>>, vector<8x512xf32>,
    %c0_127 = arith.constant 0 : index
    %c33_128 = arith.constant 33 : index
    %232 = vector.load %arg9[%c0_127, %c33_128] : memref<8x546xf32, #tpu.memory_space<vmem>>, vector<8x512xf32>
    %cst_129 = arith.constant 0.000000e+00 : f32
    %233 = vector.shape_cast %126 : vector<1x512xi1> to vector<1x512xi1>
    %234 = vector.broadcast %233 : vector<1x512xi1> to vector<8x512xi1>
    %235 = vector.broadcast %cst_129 : f32 to vector<8x512xf32>
    %236 = arith.select %234, %232, %235 : vector<8x512xi1>, vector<8x512xf32>
    %c56 = arith.constant 56 : index
    %c0_130 = arith.constant 0 : index
    %237 = vector.load %arg10[%c56, %c0_130] : memref<72x512xf32, #tpu.memory_space<vmem>>, vector<8x512xf32>
    tpu.vector_store %arg10[%c56, %c0_130], %236 {strides = array<i32>} : memref<72x512xf32, #tpu.memory_space<vmem>>, vector<8x512xf32>,
    %c0_131 = arith.constant 0 : index
    %c34_132 = arith.constant 34 : index
    %238 = vector.load %arg9[%c0_131, %c34_132] : memref<8x546xf32, #tpu.memory_space<vmem>>, vector<8x512xf32>
    %cst_133 = arith.constant 0.000000e+00 : f32
    %239 = vector.shape_cast %141 : vector<1x512xi1> to vector<1x512xi1>
    %240 = vector.broadcast %239 : vector<1x512xi1> to vector<8x512xi1>
    %241 = vector.broadcast %cst_133 : f32 to vector<8x512xf32>
    %242 = arith.select %240, %238, %241 : vector<8x512xi1>, vector<8x512xf32>
    %c64 = arith.constant 64 : index
    %c0_134 = arith.constant 0 : index
    %243 = vector.load %arg10[%c64, %c0_134] : memref<72x512xf32, #tpu.memory_space<vmem>>, vector<8x512xf32>
    tpu.vector_store %arg10[%c64, %c0_134], %242 {strides = array<i32>} : memref<72x512xf32, #tpu.memory_space<vmem>>, vector<8x512xf32>,
    %c0_135 = arith.constant 0 : index
    %c0_136 = arith.constant 0 : index
    %244 = vector.load %arg4[%c0_135, %c0_136] : memref<8x72xf32, #tpu.memory_space<vmem>>, vector<8x72xf32>
    %c0_137 = arith.constant 0 : index
    %c0_138 = arith.constant 0 : index
    %245 = vector.load %arg10[%c0_137, %c0_138] : memref<72x512xf32, #tpu.memory_space<vmem>>, vector<72x512xf32>
    %cst_139 = arith.constant dense<0.000000e+00> : vector<8x512xf32>
    %246 = tpu.matmul %244, %245, %cst_139 {dimension_numbers = #tpu.dot_dimension_numbers<[1], [0], [0], [1], [0, 0, 1, 1], [], []>} : vector<8x72xf32>, vector<72x512xf32>, vector<8x512xf32> -> vector<8x512xf32>
    %c0_140 = arith.constant 0 : index
    %c0_141 = arith.constant 0 : index
    %247 = vector.load %arg5[%c0_140, %c0_141] : memref<8x1xf32, #tpu.memory_space<vmem>>, vector<8x1xf32>
    %248 = vector.broadcast %247 : vector<8x1xf32> to vector<8x512xf32>
    %249 = arith.addf %246, %248 : vector<8x512xf32>
    %cst_142 = arith.constant 0.000000e+00 : f32
    %250 = vector.broadcast %cst_142 : f32 to vector<8x512xf32>
    %251 = arith.maximumf %249, %250 : vector<8x512xf32>
    %c0_143 = arith.constant 0 : index
    %c17_144 = arith.constant 17 : index
    %252 = vector.load %arg9[%c0_143, %c17_144] : memref<8x546xf32, #tpu.memory_space<vmem>>, vector<8x512xf32>
    tpu.vector_store %arg9[%c0_143, %c17_144], %251 {strides = array<i32>} : memref<8x546xf32, #tpu.memory_space<vmem>>, vector<8x512xf32>,
    %c0_145 = arith.constant 0 : index
    %c0_146 = arith.constant 0 : index
    %253 = vector.load %arg9[%c0_145, %c0_146] : memref<8x546xf32, #tpu.memory_space<vmem>>, vector<8x512xf32>
    %cst_147 = arith.constant 0.000000e+00 : f32
    %254 = vector.shape_cast %21 : vector<1x512xi1> to vector<1x512xi1>
    %255 = vector.broadcast %254 : vector<1x512xi1> to vector<8x512xi1>
    %256 = vector.broadcast %cst_147 : f32 to vector<8x512xf32>
    %257 = arith.select %255, %253, %256 : vector<8x512xi1>, vector<8x512xf32>
    %c0_148 = arith.constant 0 : index
    %c0_149 = arith.constant 0 : index
    %258 = vector.load %arg10[%c0_148, %c0_149] : memref<72x512xf32, #tpu.memory_space<vmem>>, vector<8x512xf32>
    tpu.vector_store %arg10[%c0_148, %c0_149], %257 {strides = array<i32>} : memref<72x512xf32, #tpu.memory_space<vmem>>, vector<8x512xf32>,
    %c0_150 = arith.constant 0 : index
    %c1_151 = arith.constant 1 : index
    %259 = vector.load %arg9[%c0_150, %c1_151] : memref<8x546xf32, #tpu.memory_space<vmem>>, vector<8x512xf32>
    %cst_152 = arith.constant 0.000000e+00 : f32
    %260 = vector.shape_cast %36 : vector<1x512xi1> to vector<1x512xi1>
    %261 = vector.broadcast %260 : vector<1x512xi1> to vector<8x512xi1>
    %262 = vector.broadcast %cst_152 : f32 to vector<8x512xf32>
    %263 = arith.select %261, %259, %262 : vector<8x512xi1>, vector<8x512xf32>
    %c8_153 = arith.constant 8 : index
    %c0_154 = arith.constant 0 : index
    %264 = vector.load %arg10[%c8_153, %c0_154] : memref<72x512xf32, #tpu.memory_space<vmem>>, vector<8x512xf32>
    tpu.vector_store %arg10[%c8_153, %c0_154], %263 {strides = array<i32>} : memref<72x512xf32, #tpu.memory_space<vmem>>, vector<8x512xf32>,
    %c0_155 = arith.constant 0 : index
    %c2_156 = arith.constant 2 : index
    %265 = vector.load %arg9[%c0_155, %c2_156] : memref<8x546xf32, #tpu.memory_space<vmem>>, vector<8x512xf32>
    %cst_157 = arith.constant 0.000000e+00 : f32
    %266 = vector.shape_cast %51 : vector<1x512xi1> to vector<1x512xi1>
    %267 = vector.broadcast %266 : vector<1x512xi1> to vector<8x512xi1>
    %268 = vector.broadcast %cst_157 : f32 to vector<8x512xf32>
    %269 = arith.select %267, %265, %268 : vector<8x512xi1>, vector<8x512xf32>
    %c16_158 = arith.constant 16 : index
    %c0_159 = arith.constant 0 : index
    %270 = vector.load %arg10[%c16_158, %c0_159] : memref<72x512xf32, #tpu.memory_space<vmem>>, vector<8x512xf32>
    tpu.vector_store %arg10[%c16_158, %c0_159], %269 {strides = array<i32>} : memref<72x512xf32, #tpu.memory_space<vmem>>, vector<8x512xf32>,
    %c0_160 = arith.constant 0 : index
    %c16_161 = arith.constant 16 : index
    %271 = vector.load %arg9[%c0_160, %c16_161] : memref<8x546xf32, #tpu.memory_space<vmem>>, vector<8x512xf32>
    %cst_162 = arith.constant 0.000000e+00 : f32
    %272 = vector.shape_cast %66 : vector<1x512xi1> to vector<1x512xi1>
    %273 = vector.broadcast %272 : vector<1x512xi1> to vector<8x512xi1>
    %274 = vector.broadcast %cst_162 : f32 to vector<8x512xf32>
    %275 = arith.select %273, %271, %274 : vector<8x512xi1>, vector<8x512xf32>
    %c24_163 = arith.constant 24 : index
    %c0_164 = arith.constant 0 : index
    %276 = vector.load %arg10[%c24_163, %c0_164] : memref<72x512xf32, #tpu.memory_space<vmem>>, vector<8x512xf32>
    tpu.vector_store %arg10[%c24_163, %c0_164], %275 {strides = array<i32>} : memref<72x512xf32, #tpu.memory_space<vmem>>, vector<8x512xf32>,
    %c0_165 = arith.constant 0 : index
    %c17_166 = arith.constant 17 : index
    %277 = vector.load %arg9[%c0_165, %c17_166] : memref<8x546xf32, #tpu.memory_space<vmem>>, vector<8x512xf32>
    %cst_167 = arith.constant 0.000000e+00 : f32
    %278 = vector.shape_cast %81 : vector<1x512xi1> to vector<1x512xi1>
    %279 = vector.broadcast %278 : vector<1x512xi1> to vector<8x512xi1>
    %280 = vector.broadcast %cst_167 : f32 to vector<8x512xf32>
    %281 = arith.select %279, %277, %280 : vector<8x512xi1>, vector<8x512xf32>
    %c32_168 = arith.constant 32 : index
    %c0_169 = arith.constant 0 : index
    %282 = vector.load %arg10[%c32_168, %c0_169] : memref<72x512xf32, #tpu.memory_space<vmem>>, vector<8x512xf32>
    tpu.vector_store %arg10[%c32_168, %c0_169], %281 {strides = array<i32>} : memref<72x512xf32, #tpu.memory_space<vmem>>, vector<8x512xf32>,
    %c0_170 = arith.constant 0 : index
    %c18_171 = arith.constant 18 : index
    %283 = vector.load %arg9[%c0_170, %c18_171] : memref<8x546xf32, #tpu.memory_space<vmem>>, vector<8x512xf32>
    %cst_172 = arith.constant 0.000000e+00 : f32
    %284 = vector.shape_cast %96 : vector<1x512xi1> to vector<1x512xi1>
    %285 = vector.broadcast %284 : vector<1x512xi1> to vector<8x512xi1>
    %286 = vector.broadcast %cst_172 : f32 to vector<8x512xf32>
    %287 = arith.select %285, %283, %286 : vector<8x512xi1>, vector<8x512xf32>
    %c40_173 = arith.constant 40 : index
    %c0_174 = arith.constant 0 : index
    %288 = vector.load %arg10[%c40_173, %c0_174] : memref<72x512xf32, #tpu.memory_space<vmem>>, vector<8x512xf32>
    tpu.vector_store %arg10[%c40_173, %c0_174], %287 {strides = array<i32>} : memref<72x512xf32, #tpu.memory_space<vmem>>, vector<8x512xf32>,
    %c0_175 = arith.constant 0 : index
    %c32_176 = arith.constant 32 : index
    %289 = vector.load %arg9[%c0_175, %c32_176] : memref<8x546xf32, #tpu.memory_space<vmem>>, vector<8x512xf32>
    %cst_177 = arith.constant 0.000000e+00 : f32
    %290 = vector.shape_cast %111 : vector<1x512xi1> to vector<1x512xi1>
    %291 = vector.broadcast %290 : vector<1x512xi1> to vector<8x512xi1>
    %292 = vector.broadcast %cst_177 : f32 to vector<8x512xf32>
    %293 = arith.select %291, %289, %292 : vector<8x512xi1>, vector<8x512xf32>
    %c48_178 = arith.constant 48 : index
    %c0_179 = arith.constant 0 : index
    %294 = vector.load %arg10[%c48_178, %c0_179] : memref<72x512xf32, #tpu.memory_space<vmem>>, vector<8x512xf32>
    tpu.vector_store %arg10[%c48_178, %c0_179], %293 {strides = array<i32>} : memref<72x512xf32, #tpu.memory_space<vmem>>, vector<8x512xf32>,
    %c0_180 = arith.constant 0 : index
    %c33_181 = arith.constant 33 : index
    %295 = vector.load %arg9[%c0_180, %c33_181] : memref<8x546xf32, #tpu.memory_space<vmem>>, vector<8x512xf32>
    %cst_182 = arith.constant 0.000000e+00 : f32
    %296 = vector.shape_cast %126 : vector<1x512xi1> to vector<1x512xi1>
    %297 = vector.broadcast %296 : vector<1x512xi1> to vector<8x512xi1>
    %298 = vector.broadcast %cst_182 : f32 to vector<8x512xf32>
    %299 = arith.select %297, %295, %298 : vector<8x512xi1>, vector<8x512xf32>
    %c56_183 = arith.constant 56 : index
    %c0_184 = arith.constant 0 : index
    %300 = vector.load %arg10[%c56_183, %c0_184] : memref<72x512xf32, #tpu.memory_space<vmem>>, vector<8x512xf32>
    tpu.vector_store %arg10[%c56_183, %c0_184], %299 {strides = array<i32>} : memref<72x512xf32, #tpu.memory_space<vmem>>, vector<8x512xf32>,
    %c0_185 = arith.constant 0 : index
    %c34_186 = arith.constant 34 : index
    %301 = vector.load %arg9[%c0_185, %c34_186] : memref<8x546xf32, #tpu.memory_space<vmem>>, vector<8x512xf32>
    %cst_187 = arith.constant 0.000000e+00 : f32
    %302 = vector.shape_cast %141 : vector<1x512xi1> to vector<1x512xi1>
    %303 = vector.broadcast %302 : vector<1x512xi1> to vector<8x512xi1>
    %304 = vector.broadcast %cst_187 : f32 to vector<8x512xf32>
    %305 = arith.select %303, %301, %304 : vector<8x512xi1>, vector<8x512xf32>
    %c64_188 = arith.constant 64 : index
    %c0_189 = arith.constant 0 : index
    %306 = vector.load %arg10[%c64_188, %c0_189] : memref<72x512xf32, #tpu.memory_space<vmem>>, vector<8x512xf32>
    tpu.vector_store %arg10[%c64_188, %c0_189], %305 {strides = array<i32>} : memref<72x512xf32, #tpu.memory_space<vmem>>, vector<8x512xf32>,
    %c0_190 = arith.constant 0 : index
    %c0_191 = arith.constant 0 : index
    %307 = vector.load %arg6[%c0_190, %c0_191] : memref<2x72xf32, #tpu.memory_space<vmem>>, vector<2x72xf32>
    %c0_192 = arith.constant 0 : index
    %c0_193 = arith.constant 0 : index
    %308 = vector.load %arg10[%c0_192, %c0_193] : memref<72x512xf32, #tpu.memory_space<vmem>>, vector<72x512xf32>
    %cst_194 = arith.constant dense<0.000000e+00> : vector<2x512xf32>
    %309 = tpu.matmul %307, %308, %cst_194 {dimension_numbers = #tpu.dot_dimension_numbers<[1], [0], [0], [1], [0, 0, 1, 1], [], []>} : vector<2x72xf32>, vector<72x512xf32>, vector<2x512xf32> -> vector<2x512xf32>
    %c0_195 = arith.constant 0 : index
    %c0_196 = arith.constant 0 : index
    %310 = vector.load %arg7[%c0_195, %c0_196] : memref<512x2xf32, #tpu.memory_space<vmem>>, vector<512x2xf32>
    %cst_197 = arith.constant dense<0.000000e+00> : vector<2x2xf32>
    %311 = tpu.matmul %309, %310, %cst_197 {dimension_numbers = #tpu.dot_dimension_numbers<[1], [0], [0], [1], [0, 0, 1, 1], [], []>} : vector<2x512xf32>, vector<512x2xf32>, vector<2x2xf32> -> vector<2x2xf32>
    %cst_198 = arith.constant dense<0xFF800000> : vector<2xf32>
    %312 = vector.multi_reduction <maximumf>, %311, %cst_198 [0] : vector<2x2xf32> to vector<2xf32>
    %313 = vector.shape_cast %312 : vector<2xf32> to vector<1x2xf32>
    %314 = vector.broadcast %313 : vector<1x2xf32> to vector<2x2xf32>
    %315 = arith.subf %311, %314 : vector<2x2xf32>
    %316 = math.exp %315 : vector<2x2xf32>
    %cst_199 = arith.constant dense<0.000000e+00> : vector<2xf32>
    %317 = vector.multi_reduction <add>, %316, %cst_199 [0] : vector<2x2xf32> to vector<2xf32>
    %318 = vector.shape_cast %317 : vector<2xf32> to vector<1x2xf32>
    %319 = vector.broadcast %318 : vector<1x2xf32> to vector<2x2xf32>
    %320 = arith.divf %316, %319 : vector<2x2xf32>
    %321 = vector.shape_cast %320 : vector<2x2xf32> to vector<1x2x2xf32>
    %c0_200 = arith.constant 0 : index
    %c0_201 = arith.constant 0 : index
    %c0_202 = arith.constant 0 : index
    %322 = vector.load %arg8[%c0_200, %c0_201, %c0_202] : memref<1x2x2xf32, #tpu.memory_space<vmem>>, vector<1x2x2xf32>
    tpu.vector_store %arg8[%c0_200, %c0_201, %c0_202], %321 {strides = array<i32>} : memref<1x2x2xf32, #tpu.memory_space<vmem>>, vector<1x2x2xf32>,
    return
  }
  func.func @transform_0(%arg0: i32) -> (i32, i32, i32) {
    %c0_i32 = arith.constant 0 : i32
    %c0_i32_0 = arith.constant 0 : i32
    %c0_i32_1 = arith.constant 0 : i32
    return %arg0, %c0_i32, %c0_i32_0 : i32, i32, i32
  }
  func.func @transform_1(%arg0: i32) -> (i32, i32) {
    %c0_i32 = arith.constant 0 : i32
    %c0_i32_0 = arith.constant 0 : i32
    %c0_i32_1 = arith.constant 0 : i32
    return %c0_i32, %c0_i32_0 : i32, i32
  }
  func.func @transform_2(%arg0: i32) -> (i32, i32) {
    %c0_i32 = arith.constant 0 : i32
    %c0_i32_0 = arith.constant 0 : i32
    %c0_i32_1 = arith.constant 0 : i32
    return %c0_i32, %c0_i32_0 : i32, i32
  }
  func.func @transform_3(%arg0: i32) -> (i32, i32) {
    %c0_i32 = arith.constant 0 : i32
    %c0_i32_0 = arith.constant 0 : i32
    %c0_i32_1 = arith.constant 0 : i32
    return %c0_i32, %c0_i32_0 : i32, i32
  }
  func.func @transform_4(%arg0: i32) -> (i32, i32) {
    %c0_i32 = arith.constant 0 : i32
    %c0_i32_0 = arith.constant 0 : i32
    %c0_i32_1 = arith.constant 0 : i32
    return %c0_i32, %c0_i32_0 : i32, i32
  }
  func.func @transform_5(%arg0: i32) -> (i32, i32) {
    %c0_i32 = arith.constant 0 : i32
    %c0_i32_0 = arith.constant 0 : i32
    %c0_i32_1 = arith.constant 0 : i32
    return %c0_i32, %c0_i32_0 : i32, i32
  }
  func.func @transform_6(%arg0: i32) -> (i32, i32) {
    %c0_i32 = arith.constant 0 : i32
    %c0_i32_0 = arith.constant 0 : i32
    %c0_i32_1 = arith.constant 0 : i32
    return %c0_i32, %c0_i32_0 : i32, i32
  }
  func.func @transform_7(%arg0: i32) -> (i32, i32, i32) {
    %c0_i32 = arith.constant 0 : i32
    %c0_i32_0 = arith.constant 0 : i32
    %c0_i32_1 = arith.constant 0 : i32
    return %arg0, %c0_i32, %c0_i32_0 : i32, i32, i32
  }
}

</mosaic_0001>

<bundles_post_ra>
// kernel: tpu_custom_call.1
= control target key start
LH: loop header
LB: loop body
LE: loop exit
PB: predicated region body
PF: predicated region fallthrough
CT: control target
= control target key end

     0   :  { %s2781_s26 = smov 17   ;;  %s4207_s0 = inlined_call_operand.vmem [shape: f32[1,1,512], index: 0, kind: input, shape index: {}]   ;;  %s4208_s1 = inlined_call_operand.vmem [shape: f32[8,9], index: 1, kind: input, shape index: {}]   ;;  %s4209_s2 = inlined_call_operand.vmem [shape: f32[8,1], index: 2, kind: input, shape index: {}]   ;;  %s4210_s3 = inlined_call_operand.vmem [shape: f32[8,72], index: 3, kind: input, shape index: {}]   ;;  %s4211_s4 = inlined_call_operand.vmem [shape: f32[8,1], index: 4, kind: input, shape index: {}]   ;;  %s4212_s5 = inlined_call_operand.vmem [shape: f32[2,72], index: 5, kind: input, shape index: {}]   ;;  %s4213_s6 = inlined_call_operand.vmem [shape: f32[512,2], index: 6, kind: input, shape index: {}]   ;;  %s4214_s7 = inlined_call_operand.hbm [shape: f32[1,2,2], index: 7, kind: output, shape index: {}]  }
   0x1   :  { %v192_v0 = vld [vmem:[%s4207_s0] sm:$0xf] }
   0x2   :  { %194 = vrot.lane.b32.xlu0 %v192_v0, %s2781_s26 }
   0x3   :  { %12 = vsyncpa [#allocation5], 0  ;;  %v27_v1 = vlaneseq  ;;  %vm4215_vm2 = vcmask 138240   ;;  %s2782_s0 = smov 127   ;;  %v4355_v45 = vmov 0  ;;  %s2784_s27 = smov 126  }
   0x4   :  { %v2783_v47 = vmov 1966171168   ;;  %v4357_v49 = vmov 0  ;;  %v4359_v51 = vmov 0  ;;  %v4361_v55 = vmov 0  ;;  %s2785_s28 = smov 112  }
   0x5   :  { %vm201_vm0 = vcmp.ge.s32.totalorder %v27_v1, 17  ;;  %vm202_vm1 = vcmp.lt.s32.totalorder %v27_v1, 529  ;;  %v2842_v3 = vand.u32 127, %v27_v1  ;;  %v2853_v9 = vshrl.u32 %v27_v1, 7  ;;  %s2786_s29 = smov 111   ;;  %s2787_s30 = smov 110  }
   0x6   :  { %vm203_vm3 = vmand %vm201_vm0, %vm202_vm1  ;;  %v239_v48 = vunpack.c.l.s4 %v2783_v47  ;;  %v4363_v59 = vmov 0  ;;  %v4365_v60 = vmov 0  ;;  %s2788_s8 = smov 96   ;;  %s2789_s9 = smov 95  }
   0x7   :  { %v2846_v6 = vadd.s32 128, %v2842_v3  ;;  %v36_v7 = vshra.s32 %v2842_v3, 4  ;;  %v2850_v8 = vadd.s32 256, %v2842_v3  ;;  %v2857_v11 = vadd.s32 384, %v2842_v3  ;;  %s2790_s10 = smov 94  }
   0x8   :  { %v2863_v16 = vsub.s32 1, %v2853_v9  ;;  %v2866_v18 = vsub.s32 0, %v2853_v9  ;;  %v32_v21 = vand.u32 15, %v2842_v3  ;;  %v2880_v28 = vsub.s32 2, %v2853_v9 }
   0x9   :  { %v37_v10 = vshra.s32 %v2846_v6, 4  ;;  %v2859_v12 = vand.u32 15, %v36_v7  ;;  %v38_v13 = vshra.s32 %v2850_v8, 4  ;;  %v39_v20 = vshra.s32 %v2857_v11, 4 }
   0xa   :  { %v2883_v29 = vsub.s32 3, %v2853_v9  ;;  %v33_v30 = vand.u32 15, %v2846_v6  ;;  %v2887_v31 = vsub.s32 4, %v2853_v9  ;;  %v34_v34 = vand.u32 15, %v2850_v8 }
   0xb   :  { %v2868_v19 = vand.u32 15, %v37_v10  ;;  %v44_v24 = vadd.s32 4294967295, %v2859_v12  ;;  %v2875_v25 = vand.u32 15, %v38_v13  ;;  %v2890_v33 = vand.u32 15, %v39_v20 }
   0xc   :  { %v2897_v38 = vadd.s32 4294967295, %v32_v21  ;;  %v35_v40 = vand.u32 15, %v2857_v11  ;;  %v2905_v41 = vadd.s32 4294967295, %v33_v30  ;;  %v2917_v46 = vadd.s32 4294967295, %v34_v34 }
   0xd   :  { %v45_v32 = vadd.s32 4294967295, %v2868_v19  ;;  %vm52_vm4 = vcmp.ge.s32.totalorder %v44_v24, 0  ;;  %vm56_vm5 = vcmp.lt.s32.totalorder %v44_v24, 16  ;;  %v46_v39 = vadd.s32 4294967295, %v2875_v25 }
   0xe   :  { %v47_v42 = vadd.s32 4294967295, %v2890_v33  ;;  %vm2910_vm8 = vmand %vm52_vm4, %vm56_vm5  ;;  %vm4219_vm9 = vcmp.ge.s32.totalorder %v2897_v38, 0  ;;  %vm4220_vm13 = vcmp.ge.s32.totalorder %v2905_v41, 0  ;;  %v2929_v50 = vadd.s32 4294967295, %v35_v40 }
   0xf   :  { %vm53_vm6 = vcmp.ge.s32.totalorder %v45_v32, 0  ;;  %vm57_vm7 = vcmp.lt.s32.totalorder %v45_v32, 16  ;;  %v4356_v45 = vsel %vm2910_vm8, 4294967295, %v4355_v45  ;;  %vm54_vm10 = vcmp.ge.s32.totalorder %v46_v39, 0  ;;  %vm2935_vm0 = vmand %vm2910_vm8, %vm4219_vm9 }
  0x10   :  { %vm58_vm11 = vcmp.lt.s32.totalorder %v46_v39, 16  ;;  %vm2922_vm12 = vmand %vm53_vm6, %vm57_vm7  ;;  %vm55_vm14 = vcmp.ge.s32.totalorder %v47_v42, 0  ;;  %vm59_vm15 = vcmp.lt.s32.totalorder %v47_v42, 16  ;;  %v4360_v51 = vsel %vm2935_vm0, 4294967295, %v4359_v51 }
  0x11   :  { %v4358_v49 = vsel %vm2922_vm12, 4294967295, %v4357_v49  ;;  %vm2941_vm1 = vmand %vm54_vm10, %vm58_vm11  ;;  %v240_v56 = vunpack.c.0.s8 %v239_v48  ;;  %vm4216_vm6 = vcmp.ge.s32.totalorder %v2929_v50, 0  ;;  %vm3005_vm11 = vcmp.lt.s32.totalorder %v27_v1, 512 }
  0x12   :  { %v4362_v55 = vsel %vm2941_vm1, 4294967295, %v4361_v55  ;;  %vm2950_vm4 = vmand %vm2922_vm12, %vm4220_vm13  ;;  %v3087_v3 = vadd.s32 1, %v34_v34  ;;  %v4373_v34 = vmov 0 }
  0x13   :  { %v4364_v59 = vsel %vm2950_vm4, 4294967295, %v4363_v59  ;;  %vm2956_vm5 = vmand %vm55_vm14, %vm59_vm15  ;;  %v2979_v13 = vsub.s32 %v240_v56, %v2853_v9  ;;  %vm4218_vm14 = vcmask 1039360  }
  0x14   :  { %v4366_v60 = vsel %vm2956_vm5, 4294967295, %v4365_v60  ;;  %vm2985_vm10 = vmand %vm2956_vm5, %vm4216_vm6  ;;  %vm4223_vm6 = vcmask 1031168   ;;  %vm4226_vm9 = vcmp.lt.s32.totalorder %v3087_v3, 16 }
  0x74   :  { %v195_v2 = vpop.permute.xlu0 %194 }
  0x75   :  { %v196_v4 = vrot.slane %v195_v2, 7 }
  0x77   :  { %v198_v5 = vsel %vm4215_vm2, %v196_v4, %v195_v2  ;;  %v4367_v2 = vmov 0 }
  0x78   :  { %204 = vst.msk [vmem:[#allocation2] ss:$8 sm:$0xf] %vm203_vm3, %v198_v5  ;;  %205 = vst.msk [vmem:[#allocation2] ss:$8 sm:$0x10] %vm203_vm3, %v198_v5 }
  0x79   :  { %vm4217_vm3 = vcmp.ge.s32.totalorder %v2917_v46, 0 }
  0x7a   :  { %vm2969_vm7 = vmand %vm2941_vm1, %vm4217_vm3 }
  0x7b   :  { %v4368_v2 = vsel %vm2969_vm7, 4294967295, %v4367_v2 }
  0x7f   :  { %v266_v14 = vld [vmem:[#allocation2] ss:$8 sm:$0xf] }
  0x80   :  { %v267_v15 = vld [vmem:[#allocation2] ss:$8 sm:$0x10] }
  0x81   :  { %v268_v17 = vor.u32 %v267_v15, %v266_v14  ;;  %v345_v26 = vld [vmem:[#allocation2] ss:$8 sm:$0xf]  ;;  %v4369_v15 = vmov 0 }
  0x82   :  { %v346_v27 = vld [vmem:[#allocation2] ss:$8 sm:$0x10]  ;;  %v4370_v15 = vsel %vm2985_vm10, 4294967295, %v4369_v15 }
  0x83   :  { %v277_v22 = vrot.slane %v268_v17, %v2863_v16  ;;  %v273_v23 = vrot.slane %v268_v17, %v2866_v18  ;;  %v281_v35 = vrot.slane %v268_v17, %v2880_v28  ;;  %v285_v36 = vrot.slane %v268_v17, %v2883_v29  ;;  %v206_v52 = vld [vmem:[#allocation2] ss:$8 sm:$0xf] }
  0x84   :  { %v347_v37 = vor.u32 %v346_v27, %v345_v26  ;;  %v289_v43 = vrot.slane %v268_v17, %v2887_v31  ;;  %v424_v57 = vld [vmem:[#allocation2] ss:$8 sm:$0xf]  ;;  %v211_v61 = vrot.slane %v206_v52, %v2866_v18  ;;  %v215_v62 = vrot.slane %v206_v52, %v2863_v16 }
  0x85   :  { %292 = vrot.lane.b32.xlu1 %v277_v22, %s2782_s0  ;;  %290 = vrot.lane.b32.xlu0 %v273_v23, %s2782_s0  ;;  %v425_v58 = vld [vmem:[#allocation2] ss:$8 sm:$0x10]  ;;  %v219_v10 = vrot.slane %v206_v52, %v2880_v28  ;;  %v223_v20 = vrot.slane %v206_v52, %v2883_v29 }
  0x86   :  { %v352_v44 = vrot.slane %v347_v37, %v2866_v18  ;;  %v356_v53 = vrot.slane %v347_v37, %v2863_v16  ;;  %v360_v54 = vrot.slane %v347_v37, %v2880_v28  ;;  %v364_v63 = vrot.slane %v347_v37, %v2883_v29  ;;  %v503_v24 = vld [vmem:[#allocation2] ss:$8 sm:$0xf] }
  0x87   :  { %v368_v0 = vrot.slane %v347_v37, %v2887_v31  ;;  %v426_v4 = vor.u32 %v425_v58, %v424_v57  ;;  %v228_v5 = vsel %vm2935_vm0, %v211_v61, 0.0  ;;  %v229_v7 = vsel %vm2950_vm4, %v215_v62, 0.0  ;;  %v504_v26 = vld [vmem:[#allocation2] ss:$8 sm:$0x10] }
  0x88   :  { %v236_v14 = vcombine.low %v228_v5, %v229_v7  ;;  %v230_v17 = vsel %vm2969_vm7, %v219_v10, 0.0  ;;  %v231_v23 = vsel %vm2985_vm10, %v223_v20, 0.0  ;;  %v505_v39 = vor.u32 %v504_v26, %v503_v24 }
  0x89   :  { %294 = vrot.lane.b32.xlu1 %v281_v35, %s2782_s0  ;;  %296 = vrot.lane.b32.xlu0 %v285_v36, %s2782_s0  ;;  %v431_v9 = vrot.slane %v426_v4, %v2866_v18  ;;  %v435_v22 = vrot.slane %v426_v4, %v2863_v16  ;;  %v237_v32 = vcombine.low %v230_v17, %v231_v23 }
  0x8a   :  { %v244_v27 = vrot.slane %v236_v14, %v2979_v13  ;;  %v439_v36 = vrot.slane %v426_v4, %v2880_v28  ;;  %v443_v37 = vrot.slane %v426_v4, %v2883_v29  ;;  %v447_v47 = vrot.slane %v426_v4, %v2887_v31 }
  0x8b   :  { %v251_v35 = vrot.slane %v237_v32, %v2979_v13  ;;  %v510_v48 = vrot.slane %v505_v39, %v2866_v18  ;;  %v514_v1 = vrot.slane %v505_v39, %v2863_v16  ;;  %v518_v52 = vrot.slane %v505_v39, %v2880_v28 }
  0x8c   :  { %v522_v56 = vrot.slane %v505_v39, %v2883_v29  ;;  %v526_v57 = vrot.slane %v505_v39, %v2887_v31 }
  0x8d   :  { %298 = vrot.lane.b32.xlu1 %v289_v43, %s2782_s0  ;;  %369 = vrot.lane.b32.xlu0 %v352_v44, %s2784_s27  ;;  %v252_v42 = vcombine.low %v244_v27, %v251_v35  ;;  %v819_v35 = vld [vmem:[#allocation2] ss:$8 sm:$0xf] }
  0x8e   :  { %v898_v43 = vld [vmem:[%s4208_s1] sm:$0xff] }
  0x8f   :  { %v259_v44 = vrot.slane %v252_v42, %v2979_v13 }
  0x91   :  { %371 = vrot.lane.b32.xlu1 %v356_v53, %s2784_s27  ;;  %373 = vrot.lane.b32.xlu0 %v360_v54, %s2784_s27  ;;  %264 = vst.msk [vmem:[#allocation3] ss:$8 sm:$0xf] %vm3005_vm11, %v259_v44  ;;  %v582_v53 = vld [vmem:[#allocation2] ss:$8 sm:$0xf] }
  0x92   :  { %v583_v54 = vld [vmem:[#allocation2] ss:$8 sm:$0x10] }
  0x93   :  { %v584_v58 = vor.u32 %v583_v54, %v582_v53 }
  0x95   :  { %375 = vrot.lane.b32.xlu1 %v364_v63, %s2784_s27  ;;  %377 = vrot.lane.b32.xlu0 %v368_v0, %s2784_s27  ;;  %v589_v61 = vrot.slane %v584_v58, %v2866_v18  ;;  %v593_v62 = vrot.slane %v584_v58, %v2863_v16  ;;  %v661_v63 = vld [vmem:[#allocation2] ss:$8 sm:$0xf]  ;;  %v597_v4 = vrot.slane %v584_v58, %v2880_v28 }
  0x96   :  { %v662_v0 = vld [vmem:[#allocation2] ss:$8 sm:$0x10]  ;;  %v601_v5 = vrot.slane %v584_v58, %v2883_v29  ;;  %v605_v10 = vrot.slane %v584_v58, %v2887_v31  ;;  %v3077_v58 = vadd.s32 1, %v33_v30 }
  0x97   :  { %v663_v7 = vor.u32 %v662_v0, %v661_v63 }
  0x98   :  { %vm4221_vm2 = vcmp.lt.s32.totalorder %v3077_v58, 16 }
  0x99   :  { %448 = vrot.lane.b32.xlu1 %v431_v9, %s2785_s28  ;;  %450 = vrot.lane.b32.xlu0 %v435_v22, %s2785_s28  ;;  %v668_v14 = vrot.slane %v663_v7, %v2866_v18  ;;  %v672_v17 = vrot.slane %v663_v7, %v2863_v16  ;;  %v676_v20 = vrot.slane %v663_v7, %v2880_v28  ;;  %v740_v9 = vld [vmem:[#allocation2] ss:$8 sm:$0xf] }
  0x9a   :  { %v741_v22 = vld [vmem:[#allocation2] ss:$8 sm:$0x10]  ;;  %v680_v23 = vrot.slane %v663_v7, %v2883_v29  ;;  %v684_v24 = vrot.slane %v663_v7, %v2887_v31 }
  0x9b   :  { %v742_v26 = vor.u32 %v741_v22, %v740_v9 }
  0x9d   :  { %452 = vrot.lane.b32.xlu1 %v439_v36, %s2785_s28  ;;  %454 = vrot.lane.b32.xlu0 %v443_v37, %s2785_s28  ;;  %v747_v27 = vrot.slane %v742_v26, %v2866_v18  ;;  %v751_v32 = vrot.slane %v742_v26, %v2863_v16  ;;  %v820_v36 = vld [vmem:[#allocation2] ss:$8 sm:$0x10]  ;;  %v755_v37 = vrot.slane %v742_v26, %v2880_v28 }
  0x9e   :  { %v759_v39 = vrot.slane %v742_v26, %v2883_v29  ;;  %v821_v42 = vor.u32 %v820_v36, %v819_v35  ;;  %v763_v44 = vrot.slane %v742_v26, %v2887_v31  ;;  %v4379_v35 = vmov 0 }
  0xa0   :  { %v842_v53 = vrot.slane %v821_v42, %v2887_v31  ;;  %v3073_v31 = vadd.s32 1, %v32_v21 }
  0xa1   :  { %456 = vrot.lane.b32.xlu1 %v447_v47, %s2785_s28  ;;  %527 = vrot.lane.b32.xlu0 %v510_v48, %s2786_s29  ;;  %v826_v47 = vrot.slane %v821_v42, %v2866_v18  ;;  %v830_v48 = vrot.slane %v821_v42, %v2863_v16  ;;  %v4279_v18 = vmov 0.0   ;;  %v907_v16 = vld [vmem:[%s4209_s2] sm:$0xff] }
  0xa2   :  { %994 = vmatprep.mubr.f32.mxu0 %v4279_v18  ;;  %1065 = vmatprep.mubr.f32.mxu1 %v4279_v18  ;;  %vm4222_vm15 = vcmp.lt.s32.totalorder %v3073_v31, 16 }
  0xa3   :  { %vm3105_vm3 = vmand %vm2910_vm8, %vm4222_vm15 }
  0xa4   :  { %v4374_v34 = vsel %vm3105_vm3, 4294967295, %v4373_v34 }
  0xa5   :  { %529 = vrot.lane.b32.xlu1 %v514_v1, %s2786_s29  ;;  %531 = vrot.lane.b32.xlu0 %v518_v52, %s2786_s29  ;;  %v834_v1 = vrot.slane %v821_v42, %v2880_v28  ;;  %v838_v52 = vrot.slane %v821_v42, %v2883_v29  ;;  %v2792_v28 = vmov 0  }
  0xa6   :  { %2647 = vset.pattern.permute.xlu1 %v2792_v28  ;;  %2648 = vset.pattern.permute.xlu0 %v2792_v28 }
  0xa9   :  { %533 = vrot.lane.b32.xlu1 %v522_v56, %s2786_s29  ;;  %535 = vrot.lane.b32.xlu0 %v526_v57, %s2786_s29 }
  0xad   :  { %606 = vrot.lane.b32.xlu1 %v589_v61, %s2787_s30  ;;  %608 = vrot.lane.b32.xlu0 %v593_v62, %s2787_s30 }
  0xb1   :  { %610 = vrot.lane.b32.xlu1 %v597_v4, %s2787_s30  ;;  %612 = vrot.lane.b32.xlu0 %v601_v5, %s2787_s30  ;;  %v3094_v4 = vadd.s32 1, %v35_v40  ;;  %v4375_v40 = vmov 0 }
  0xb3   :  { %vm4229_vm13 = vcmp.lt.s32.totalorder %v3094_v4, 16  ;;  %vm4414_vm0 = vcmp.lt.s32.totalorder %v3094_v4, 16 }
  0xb4   :  { %vm3139_vm15 = vmand %vm2956_vm5, %vm4229_vm13  ;;  %vm116_vm13 = vcmp.ge.s32.totalorder %v2859_v12, 0 }
  0xb5   :  { %614 = vrot.lane.b32.xlu1 %v605_v10, %s2787_s30  ;;  %685 = vrot.lane.b32.xlu0 %v668_v14, %s2788_s8  ;;  %v4380_v35 = vsel %vm3139_vm15, 4294967295, %v4379_v35 }
  0xb9   :  { %687 = vrot.lane.b32.xlu1 %v672_v17, %s2788_s8  ;;  %689 = vrot.lane.b32.xlu0 %v676_v20, %s2788_s8 }
  0xbd   :  { %691 = vrot.lane.b32.xlu1 %v680_v23, %s2788_s8  ;;  %693 = vrot.lane.b32.xlu0 %v684_v24, %s2788_s8 }
  0xc1   :  { %764 = vrot.lane.b32.xlu1 %v747_v27, %s2789_s9  ;;  %766 = vrot.lane.b32.xlu0 %v751_v32, %s2789_s9  ;;  %v4377_v27 = vmov 0 }
  0xc5   :  { %768 = vrot.lane.b32.xlu1 %v755_v37, %s2789_s9  ;;  %770 = vrot.lane.b32.xlu0 %v759_v39, %s2789_s9 }
  0xc9   :  { %772 = vrot.lane.b32.xlu1 %v763_v44, %s2789_s9  ;;  %843 = vrot.lane.b32.xlu0 %v826_v47, %s2790_s10 }
  0xcd   :  { %845 = vrot.lane.b32.xlu1 %v830_v48, %s2790_s10  ;;  %847 = vrot.lane.b32.xlu0 %v834_v1, %s2790_s10 }
  0xd1   :  { %849 = vrot.lane.b32.xlu1 %v838_v52, %s2790_s10  ;;  %851 = vrot.lane.b32.xlu0 %v842_v53, %s2790_s10  ;;  %v4383_v53 = vmov 0 }
  0xd5   :  { %910 = vperm.xlu1 %2647, %v907_v16  }
  0xf7   :  { %v293_v29 = vpop.permute.xlu1 %292  ;;  %v291_v54 = vpop.permute.xlu0 %290 }
  0xf8   :  { %v301_v61 = vsel %vm4218_vm14, %v291_v54, %v293_v29 }
  0xf9   :  { %v309_v6 = vsel %vm2910_vm8, %v301_v61, 0.0 }
  0xfb   :  { %v295_v56 = vpop.permute.xlu1 %294  ;;  %v297_v57 = vpop.permute.xlu0 %296 }
  0xfc   :  { %v302_v62 = vsel %vm4218_vm14, %v293_v29, %v295_v56  ;;  %v303_v0 = vsel %vm4218_vm14, %v295_v56, %v297_v57  ;;  %v4385_v56 = vmov 0 }
  0xfd   :  { %v310_v63 = vsel %vm2922_vm12, %v302_v62, 0.0  ;;  %v311_v10 = vsel %vm2941_vm1, %v303_v0, 0.0  ;;  %v4390_v62 = vmov 0 }
  0xfe   :  { %v317_v5 = vcombine.low %v309_v6, %v310_v63  ;;  %v4392_v6 = vmov 0 }
  0xff   :  { %v299_v21 = vpop.permute.xlu1 %298  ;;  %v370_v30 = vpop.permute.xlu0 %369 }
 0x100   :  { %v304_v7 = vsel %vm4218_vm14, %v297_v57, %v299_v21  ;;  %vm3113_vm14 = vmand %vm2922_vm12, %vm4221_vm2  ;;  %v325_v20 = vrot.slane %v317_v5, %v2979_v13  ;;  %v4388_v57 = vmov 0 }
 0x101   :  { %v312_v8 = vsel %vm2956_vm5, %v304_v7, 0.0  ;;  %v4376_v40 = vsel %vm3113_vm14, 4294967295, %v4375_v40  ;;  %vm3131_vm2 = vmand %vm2941_vm1, %vm4226_vm9  ;;  %vm4381_vm9 = vcmask 1031168   ;;  %vm120_vm1 = vcmp.lt.s32.totalorder %v2859_v12, 16 }
 0x102   :  { %v318_v11 = vcombine.low %v311_v10, %v312_v8  ;;  %v4378_v27 = vsel %vm3131_vm2, 4294967295, %v4377_v27  ;;  %vm4387_vm5 = vcmp.ge.s32.totalorder %v2905_v41, 0  ;;  %v4398_v8 = vmov 0 }
 0x103   :  { %v372_v14 = vpop.permute.xlu1 %371  ;;  %v374_v17 = vpop.permute.xlu0 %373 }
 0x104   :  { %v332_v9 = vrot.slane %v318_v11, %v2979_v13  ;;  %v380_v22 = vsel %vm4223_vm6, %v370_v30, %v372_v14  ;;  %v381_v23 = vsel %vm4223_vm6, %v372_v14, %v374_v17  ;;  %vm117_vm6 = vcmp.ge.s32.totalorder %v2868_v19, 0 }
 0x105   :  { %v388_v24 = vsel %vm3105_vm3, %v380_v22, 0.0  ;;  %v389_v26 = vsel %vm3113_vm14, %v381_v23, 0.0  ;;  %vm121_vm3 = vcmp.lt.s32.totalorder %v2868_v19, 16  ;;  %vm4382_vm14 = vmmov %vm4381_vm9  ;;  %v4395_v30 = vmov 0 }
 0x106   :  { %v333_v32 = vcombine.low %v325_v20, %v332_v9  ;;  %v396_v42 = vcombine.low %v388_v24, %v389_v26  ;;  %vm3156_vm7 = vmand %vm117_vm6, %vm121_vm3  ;;  %vm123_vm3 = vcmp.lt.s32.totalorder %v2890_v33, 16  ;;  %vm4245_vm6 = vcmask 916480  }
 0x107   :  { %v376_v36 = vpop.permute.xlu1 %375  ;;  %v378_v37 = vpop.permute.xlu0 %377  ;;  %v4384_v53 = vsel %vm3156_vm7, 4294967295, %v4383_v53  ;;  %vm3174_vm10 = vmand %vm3156_vm7, %vm4387_vm5  ;;  %v4401_v14 = vmov 0 }
 0x108   :  { %v340_v39 = vrot.slane %v333_v32, %v2979_v13  ;;  %v382_v44 = vsel %vm4381_vm9, %v374_v17, %v376_v36  ;;  %v383_v47 = vsel %vm4382_vm14, %v376_v36, %v378_v37  ;;  %vm118_vm9 = vcmp.ge.s32.totalorder %v2875_v25, 0 }
 0x109   :  { %v390_v48 = vsel %vm3131_vm2, %v382_v44, 0.0  ;;  %v391_v1 = vsel %vm3139_vm15, %v383_v47, 0.0  ;;  %vm122_vm14 = vcmp.lt.s32.totalorder %v2875_v25, 16  ;;  %v404_v29 = vrot.slane %v396_v42, %v2979_v13  ;;  %vm3164_vm2 = vmand %vm116_vm13, %vm120_vm1 }
 0x10a   :  { %343 = vst.msk [vmem:[#allocation3 + $0x1] ss:$8 sm:$0xf] %vm3005_vm11, %v340_v39  ;;  %v397_v52 = vcombine.low %v390_v48, %v391_v1  ;;  %v4386_v56 = vsel %vm3164_vm2, 4294967295, %v4385_v56  ;;  %vm119_vm15 = vcmp.ge.s32.totalorder %v2890_v33, 0  ;;  %v4389_v57 = vsel %vm3174_vm10, 4294967295, %v4388_v57  ;;  %vm3178_vm8 = vmand %vm118_vm9, %vm122_vm14 }
 0x10b   :  { %v449_v16 = vpop.permute.xlu1 %448  ;;  %v451_v28 = vpop.permute.xlu0 %450  ;;  %v4391_v62 = vsel %vm3178_vm8, 4294967295, %v4390_v62  ;;  %vm3182_vm13 = vmand %vm119_vm15, %vm123_vm3  ;;  %vm4394_vm1 = vcmp.ge.s32.totalorder %v2897_v38, 0  ;;  %vm4397_vm15 = vcmp.ge.s32.totalorder %v2917_v46, 0  ;;  %vm4400_vm14 = vcmp.ge.s32.totalorder %v2929_v50, 0 }
 0x10c   :  { %v411_v54 = vrot.slane %v397_v52, %v2979_v13  ;;  %v4393_v6 = vsel %vm3182_vm13, 4294967295, %v4392_v6  ;;  %vm3191_vm5 = vmand %vm3164_vm2, %vm4394_vm1  ;;  %v459_v5 = vsel %vm4245_vm6, %v449_v16, %v451_v28  ;;  %vm4244_vm1 = vcmask 908288  }
 0x10d   :  { %v4396_v30 = vsel %vm3191_vm5, 4294967295, %v4395_v30  ;;  %vm3203_vm9 = vmand %vm3178_vm8, %vm4397_vm15  ;;  %v467_v17 = vsel %vm3191_vm5, %v459_v5, 0.0  ;;  %vm4409_vm15 = vcmp.lt.s32.totalorder %v3087_v3, 16 }
 0x10e   :  { %v412_v61 = vcombine.low %v404_v29, %v411_v54  ;;  %v4399_v8 = vsel %vm3203_vm9, 4294967295, %v4398_v8  ;;  %vm3214_vm3 = vmand %vm3182_vm13, %vm4400_vm14  ;;  %vm4403_vm14 = vcmp.lt.s32.totalorder %v3073_v31, 16 }
 0x10f   :  { %v453_v63 = vpop.permute.xlu1 %452  ;;  %v455_v0 = vpop.permute.xlu0 %454  ;;  %v4402_v14 = vsel %vm3214_vm3, 4294967295, %v4401_v14  ;;  %vm3278_vm12 = vmand %vm3182_vm13, %vm4414_vm0 }
 0x110   :  { %v419_v21 = vrot.slane %v412_v61, %v2979_v13  ;;  %v460_v7 = vsel %vm4245_vm6, %v451_v28, %v453_v63  ;;  %v461_v11 = vsel %vm4245_vm6, %v453_v63, %v455_v0 }
 0x111   :  { %v468_v10 = vsel %vm3174_vm10, %v460_v7, 0.0  ;;  %v469_v24 = vsel %vm3203_vm9, %v461_v11, 0.0  ;;  %v152_v7 = vadd.s32 1, %v2859_v12  ;;  %v4407_v12 = vmov 0 }
 0x112   :  { %422 = vst.msk [vmem:[#allocation3 + $0x2] ss:$8 sm:$0xf] %vm3005_vm11, %v419_v21  ;;  %v475_v22 = vcombine.low %v467_v17, %v468_v10  ;;  %v153_v17 = vadd.s32 1, %v2868_v19 }
 0x113   :  { %v457_v20 = vpop.permute.xlu1 %456  ;;  %v528_v9 = vpop.permute.xlu0 %527  ;;  %vm156_vm9 = vcmp.ge.s32.totalorder %v152_v7, 0  ;;  %vm160_vm10 = vcmp.lt.s32.totalorder %v152_v7, 16 }
 0x114   :  { %v462_v23 = vsel %vm4245_vm6, %v455_v0, %v457_v20  ;;  %v483_v39 = vrot.slane %v475_v22, %v2979_v13  ;;  %v4404_v22 = vmov 0  ;;  %vm4406_vm6 = vcmp.lt.s32.totalorder %v3077_v58, 16 }
 0x115   :  { %v470_v26 = vsel %vm3214_vm3, %v462_v23, 0.0  ;;  %vm3258_vm5 = vmand %vm3156_vm7, %vm4406_vm6  ;;  %vm161_vm3 = vcmp.lt.s32.totalorder %v153_v17, 16  ;;  %vm4412_vm6 = vcmask 900096  }
 0x116   :  { %v476_v32 = vcombine.low %v469_v24, %v470_v26  ;;  %v4408_v12 = vsel %vm3258_vm5, 4294967295, %v4407_v12  ;;  %v4410_v26 = vmov 0 }
 0x117   :  { %v530_v36 = vpop.permute.xlu1 %529  ;;  %v532_v37 = vpop.permute.xlu0 %531 }
 0x118   :  { %v490_v42 = vrot.slane %v476_v32, %v2979_v13  ;;  %v538_v44 = vsel %vm4244_vm1, %v528_v9, %v530_v36  ;;  %v539_v47 = vsel %vm4244_vm1, %v530_v36, %v532_v37  ;;  %v154_v32 = vadd.s32 1, %v2875_v25 }
 0x119   :  { %v546_v48 = vsel %vm3164_vm2, %v538_v44, 0.0  ;;  %v547_v1 = vsel %vm3156_vm7, %v539_v47, 0.0  ;;  %vm4413_vm7 = vmmov %vm4412_vm6  ;;  %v155_v44 = vadd.s32 1, %v2890_v33  ;;  %v4417_v25 = vmov 0 }
 0x11a   :  { %v491_v52 = vcombine.low %v483_v39, %v490_v42  ;;  %v554_v54 = vcombine.low %v546_v48, %v547_v1  ;;  %v4415_v42 = vmov 0  ;;  %v4421_v1 = vmov 0 }
 0x11b   :  { %v534_v16 = vpop.permute.xlu1 %533  ;;  %v536_v28 = vpop.permute.xlu0 %535  ;;  %v4416_v42 = vsel %vm3278_vm12, 4294967295, %v4415_v42  ;;  %vm158_vm0 = vcmp.ge.s32.totalorder %v154_v32, 0 }
 0x11c   :  { %v498_v29 = vrot.slane %v491_v52, %v2979_v13  ;;  %v540_v61 = vsel %vm4244_vm1, %v532_v37, %v534_v16  ;;  %v541_v63 = vsel %vm4244_vm1, %v534_v16, %v536_v28  ;;  %v562_v20 = vrot.slane %v554_v54, %v2979_v13  ;;  %vm3250_vm1 = vmand %vm3164_vm2, %vm4403_vm14 }
 0x11d   :  { %v548_v0 = vsel %vm3178_vm8, %v540_v61, 0.0  ;;  %v549_v21 = vsel %vm3182_vm13, %v541_v63, 0.0  ;;  %v4405_v22 = vsel %vm3250_vm1, 4294967295, %v4404_v22  ;;  %vm3266_vm14 = vmand %vm3178_vm8, %vm4409_vm15  ;;  %vm157_vm2 = vcmp.ge.s32.totalorder %v153_v17, 0 }
 0x11e   :  { %501 = vst.msk [vmem:[#allocation3 + $0x3] ss:$8 sm:$0xf] %vm3005_vm11, %v498_v29  ;;  %v555_v5 = vcombine.low %v548_v0, %v549_v21  ;;  %v4411_v26 = vsel %vm3266_vm14, 4294967295, %v4410_v26  ;;  %vm3285_vm15 = vmand %vm156_vm9, %vm160_vm10  ;;  %vm162_vm8 = vcmp.lt.s32.totalorder %v154_v32, 16  ;;  %vm4424_vm9 = vcmp.ge.s32.totalorder %v2897_v38, 0 }
 0x11f   :  { %v607_v10 = vpop.permute.xlu1 %606  ;;  %v609_v11 = vpop.permute.xlu0 %608  ;;  %v4418_v25 = vsel %vm3285_vm15, 4294967295, %v4417_v25  ;;  %v4425_v54 = vmov 0  ;;  %v4429_v38 = vmov 0  ;;  %v4431_v21 = vmov 0 }
 0x120   :  { %v569_v9 = vrot.slane %v555_v5, %v2979_v13  ;;  %v617_v37 = vsel %vm4412_vm6, %v607_v10, %v609_v11  ;;  %4419 = vst [vmem:[#allocation7_spill] sm:$0xff] %v4418_v25  ;;  %v4434_v10 = vmov 0  ;;  %v4441_v32 = vmov 0 }
 0x121   :  { %v625_v52 = vsel %vm3250_vm1, %v617_v37, 0.0  ;;  %vm4428_vm1 = vcmp.ge.s32.totalorder %v2905_v41, 0 }
 0x122   :  { %v570_v23 = vcombine.low %v562_v20, %v569_v9 }
 0x123   :  { %v611_v19 = vpop.permute.xlu1 %610  ;;  %v613_v24 = vpop.permute.xlu0 %612 }
 0x124   :  { %v577_v36 = vrot.slane %v570_v23, %v2979_v13  ;;  %v618_v39 = vsel %vm4413_vm7, %v609_v11, %v611_v19  ;;  %vm4420_vm7 = vmmov %vm4412_vm6 }
 0x125   :  { %v626_v47 = vsel %vm3258_vm5, %v618_v39, 0.0  ;;  %v619_v48 = vsel %vm4420_vm7, %v611_v19, %v613_v24  ;;  %vm3292_vm6 = vmand %vm157_vm2, %vm161_vm3  ;;  %vm159_vm2 = vcmp.ge.s32.totalorder %v155_v44, 0  ;;  %vm163_vm3 = vcmp.lt.s32.totalorder %v155_v44, 16 }
 0x126   :  { %580 = vst.msk [vmem:[#allocation3 + $0x4] ss:$8 sm:$0xf] %vm3005_vm11, %v577_v36  ;;  %v4422_v1 = vsel %vm3292_vm6, 4294967295, %v4421_v1  ;;  %v633_v28 = vcombine.low %v625_v52, %v626_v47  ;;  %vm4423_vm10 = vmmov %vm4420_vm7  ;;  %v627_v61 = vsel %vm3266_vm14, %v619_v48, 0.0  ;;  %vm4270_vm7 = vcmask 785408  }
 0x127   :  { %v615_v33 = vpop.permute.xlu1 %614  ;;  %v686_v16 = vpop.permute.xlu0 %685  ;;  %vm3303_vm5 = vmand %vm3285_vm15, %vm4424_vm9  ;;  %v4437_v19 = vmov 0 }
 0x128   :  { %v620_v29 = vsel %vm4423_vm10, %v613_v24, %v615_v33  ;;  %v4426_v54 = vsel %vm3303_vm5, 4294967295, %v4425_v54  ;;  %vm3315_vm10 = vmand %vm3292_vm6, %vm4428_vm1  ;;  %v641_v11 = vrot.slane %v633_v28, %v2979_v13 }
 0x129   :  { %4427 = vst [vmem:[#allocation8_spill] sm:$0xff] %v4426_v54  ;;  %v628_v63 = vsel %vm3278_vm12, %v620_v29, 0.0  ;;  %v4430_v38 = vsel %vm3315_vm10, 4294967295, %v4429_v38  ;;  %vm3319_vm9 = vmand %vm158_vm0, %vm162_vm8  ;;  %vm4436_vm8 = vcmp.ge.s32.totalorder %v2917_v46, 0  ;;  %vm4440_vm0 = vcmp.ge.s32.totalorder %v2929_v50, 0 }
 0x12a   :  { %v634_v0 = vcombine.low %v627_v61, %v628_v63  ;;  %v4432_v21 = vsel %vm3319_vm9, 4294967295, %v4431_v21  ;;  %vm3323_vm14 = vmand %vm159_vm2, %vm163_vm3  ;;  %vm4273_vm3 = vcmask 777216  }
 0x12b   :  { %4433 = vst [vmem:[#allocation9_spill] sm:$0xff] %v4432_v21  ;;  %v688_v5 = vpop.permute.xlu1 %687  ;;  %v690_v7 = vpop.permute.xlu0 %689  ;;  %v4435_v10 = vsel %vm3323_vm14, 4294967295, %v4434_v10  ;;  %vm3339_vm1 = vmand %vm3319_vm9, %vm4436_vm8  ;;  %vm4276_vm8 = vcmask 769024  }
 0x12c   :  { %v648_v41 = vrot.slane %v634_v0, %v2979_v13  ;;  %v696_v17 = vsel %vm4270_vm7, %v686_v16, %v688_v5  ;;  %v697_v20 = vsel %vm4270_vm7, %v688_v5, %v690_v7  ;;  %v4438_v19 = vsel %vm3339_vm1, 4294967295, %v4437_v19  ;;  %vm3347_vm2 = vmand %vm3323_vm14, %vm4440_vm0 }
 0x12d   :  { %v704_v9 = vsel %vm3303_vm5, %v696_v17, 0.0  ;;  %v705_v23 = vsel %vm3315_vm10, %v697_v20, 0.0  ;;  %4439 = vst [vmem:[#allocation10_spill] sm:$0xff] %v4438_v19  ;;  %v4442_v32 = vsel %vm3347_vm2, 4294967295, %v4441_v32  ;;  %vm4443_vm0 = vcmp.lt.s32.totalorder %v3073_v31, 16 }
 0x12e   :  { %v649_v24 = vcombine.low %v641_v11, %v648_v41  ;;  %v712_v46 = vcombine.low %v704_v9, %v705_v23  ;;  %vm4447_vm5 = vcmp.lt.s32.totalorder %v3077_v58, 16 }
 0x12f   :  { %v692_v36 = vpop.permute.xlu1 %691  ;;  %v694_v37 = vpop.permute.xlu0 %693 }
 0x130   :  { %v656_v39 = vrot.slane %v649_v24, %v2979_v13  ;;  %v698_v44 = vsel %vm4270_vm7, %v690_v7, %v692_v36  ;;  %v699_v47 = vsel %vm4270_vm7, %v692_v36, %v694_v37  ;;  %v720_v28 = vrot.slane %v712_v46, %v2979_v13  ;;  %vm3381_vm7 = vmand %vm3285_vm15, %vm4443_vm0 }
 0x131   :  { %v706_v48 = vsel %vm3339_vm1, %v698_v44, 0.0  ;;  %v707_v50 = vsel %vm3347_vm2, %v699_v47, 0.0  ;;  %v4444_v46 = vmov 0  ;;  %v4448_v47 = vmov 0 }
 0x132   :  { %659 = vst.msk [vmem:[#allocation3 + $0x5] ss:$8 sm:$0xf] %vm3005_vm11, %v656_v39  ;;  %v713_v52 = vcombine.low %v706_v48, %v707_v50  ;;  %v4445_v46 = vsel %vm3381_vm7, 4294967295, %v4444_v46 }
 0x133   :  { %v765_v33 = vpop.permute.xlu1 %764  ;;  %v767_v16 = vpop.permute.xlu0 %766  ;;  %4446 = vst [vmem:[#allocation11_spill] sm:$0xff] %v4445_v46 }
 0x134   :  { %v727_v29 = vrot.slane %v713_v52, %v2979_v13  ;;  %v775_v7 = vsel %vm4273_vm3, %v765_v33, %v767_v16 }
 0x135   :  { %v783_v20 = vsel %vm3285_vm15, %v775_v7, 0.0  ;;  %vm4455_vm15 = vcmp.lt.s32.totalorder %v3094_v4, 16 }
 0x136   :  { %v728_v61 = vcombine.low %v720_v28, %v727_v29  ;;  %v4452_v29 = vmov 0 }
 0x137   :  { %v769_v63 = vpop.permute.xlu1 %768  ;;  %v771_v0 = vpop.permute.xlu0 %770 }
 0x138   :  { %v735_v5 = vrot.slane %v728_v61, %v2979_v13  ;;  %v776_v11 = vsel %vm4273_vm3, %v767_v16, %v769_v63  ;;  %v777_v17 = vsel %vm4273_vm3, %v769_v63, %v771_v0  ;;  %v4456_v63 = vmov 0 }
 0x139   :  { %v784_v41 = vsel %vm3292_vm6, %v776_v11, 0.0  ;;  %v785_v37 = vsel %vm3319_vm9, %v777_v17, 0.0 }
 0x13a   :  { %738 = vst.msk [vmem:[#allocation3 + $0x6] ss:$8 sm:$0xf] %vm3005_vm11, %v735_v5  ;;  %v791_v24 = vcombine.low %v783_v20, %v784_v41 }
 0x13b   :  { %v773_v9 = vpop.permute.xlu1 %772  ;;  %v844_v23 = vpop.permute.xlu0 %843 }
 0x13c   :  { %v778_v36 = vsel %vm4273_vm3, %v771_v0, %v773_v9  ;;  %vm3389_vm3 = vmand %vm3292_vm6, %vm4447_vm5  ;;  %v799_v52 = vrot.slane %v791_v24, %v2979_v13  ;;  %vm4451_vm5 = vcmp.lt.s32.totalorder %v3087_v3, 16 }
 0x13d   :  { %v786_v39 = vsel %vm3323_vm14, %v778_v36, 0.0  ;;  %v4449_v47 = vsel %vm3389_vm3, 4294967295, %v4448_v47  ;;  %vm3405_vm0 = vmand %vm3319_vm9, %vm4451_vm5 }
 0x13e   :  { %v792_v44 = vcombine.low %v785_v37, %v786_v39  ;;  %4450 = vst [vmem:[#allocation12_spill] sm:$0xff] %v4449_v47  ;;  %v4453_v29 = vsel %vm3405_vm0, 4294967295, %v4452_v29 }
 0x13f   :  { %v846_v48 = vpop.permute.xlu1 %845  ;;  %v848_v50 = vpop.permute.xlu0 %847  ;;  %4454 = vst [vmem:[#allocation13_spill] sm:$0xff] %v4453_v29 }
 0x140   :  { %v806_v31 = vrot.slane %v792_v44, %v2979_v13  ;;  %v854_v33 = vsel %vm4276_vm8, %v844_v23, %v846_v48  ;;  %v855_v16 = vsel %vm4276_vm8, %v846_v48, %v848_v50  ;;  %vm3413_vm8 = vmand %vm3323_vm14, %vm4455_vm15  ;;  %vm917_vm15 = vcmask 1040384  }
 0x141   :  { %v862_v28 = vsel %vm3381_vm7, %v854_v33, 0.0  ;;  %v863_v58 = vsel %vm3389_vm3, %v855_v16, 0.0  ;;  %v4457_v63 = vsel %vm3413_vm8, 4294967295, %v4456_v63  ;;  %vm4459_vm7 = vcmask 769024  }
 0x142   :  { %v807_v61 = vcombine.low %v799_v52, %v806_v31  ;;  %4458 = vst [vmem:[#allocation14_spill] sm:$0xff] %v4457_v63  ;;  %v870_v3 = vcombine.low %v862_v28, %v863_v58  ;;  %vm4460_vm5 = vmmov %vm4459_vm7  ;;  %vm4473_vm3 = vnez %v4358_v49 }
 0x143   :  { %v850_v0 = vpop.permute.xlu1 %849  ;;  %v852_v5 = vpop.permute.xlu0 %851  ;;  %vm4304_vm9 = vmpackc.low %vm4473_vm3, %vm2950_vm4  ;;  %vm4479_vm3 = vcmask 900096   ;;  %vm4482_vm4 = vcmask 1031168  }
 0x144   :  { %v814_v7 = vrot.slane %v807_v61, %v2979_v13  ;;  %v856_v11 = vsel %vm4459_vm7, %v848_v50, %v850_v0  ;;  %v857_v41 = vsel %vm4460_vm5, %v850_v0, %v852_v5  ;;  %v878_v9 = vrot.slane %v870_v3, %v2979_v13 }
 0x145   :  { %v864_v17 = vsel %vm3405_vm0, %v856_v11, 0.0  ;;  %v865_v4 = vsel %vm3413_vm8, %v857_v41, 0.0  ;;  %vm2793_vm7 = vmmov 1  }
 0x146   :  { %817 = vst.msk [vmem:[#allocation3 + $0x7] ss:$8 sm:$0xf] %vm3005_vm11, %v814_v7  ;;  %v871_v20 = vcombine.low %v864_v17, %v865_v4  ;;  %vm3431_vm5 = vmpackc.low %vm917_vm15, %vm2793_vm7  ;;  %vm4287_vm15 = vcmask 1047688   ;;  %vm4463_vm7 = vcmask 138240  }
 0x148   :  { %v885_v23 = vrot.slane %v871_v20, %v2979_v13 }
 0x14a   :  { %v886_v24 = vcombine.low %v878_v9, %v885_v23 }
 0x14c   :  { %v893_v36 = vrot.slane %v886_v24, %v2979_v13 }
 0x14d   :  { %v900_v39 = vld [vmem:[#allocation3 + $0x8] sm:$0xff]  ;;  %v902_v44 = vld [vmem:[#allocation3 + $0x18] sm:$0xff]  ;;  %v899_v48 = vld [vmem:[#allocation3] sm:$0xff] }
 0x14e   :  { %896 = vst.msk [vmem:[#allocation3 + $0x20] ss:$8 sm:$0xf] %vm3005_vm11, %v893_v36  ;;  %v901_v58 = vld [vmem:[#allocation3 + $0x10] sm:$0xff]  ;;  %vm913_vm11 = vcmask 72704  }
 0x154   :  { %v911_v0 = vpop.permute.xlu1 %910 }
 0x155   :  { %v904_v50 = vld [vmem:[#allocation3 + $0x28] sm:$0x1]  ;;  %v906_v52 = vld [vmem:[#allocation3 + $0x38] sm:$0x1]  ;;  %v903_v31 = vld [vmem:[#allocation3 + $0x20] sm:$0x1] }
 0x156   :  { %v2493_v33 = vpack.c.bf16 %v904_v50, %v900_v39  ;;  %v2499_v16 = vpack.c.bf16 %v906_v52, %v902_v44  ;;  %v2496_v28 = vpack.c.bf16 %v903_v31, %v899_v48  ;;  %v905_v13 = vld [vmem:[#allocation3 + $0x30] sm:$0x1] }
 0x157   :  { %v2502_v61 = vpack.c.bf16 %v905_v13, %v901_v58 }
 0x158   :  { %2495 = vmatprep.subr.msk.bf16.mxu0 %vm3431_vm5, %v2493_v33  ;;  %2501 = vmatprep.subr.msk.bf16.mxu1 %vm3431_vm5, %v2499_v16 }
 0x159   :  { %2498 = vmatpush1.bf16.msk.msra.mxu0 %vm3431_vm5, %v2496_v28  ;;  %2504 = vmatpush1.bf16.msk.msra.mxu1 %vm3431_vm5, %v2502_v61  ;;  %vm4464_vm5 = vmmov %vm4463_vm7  ;;  %v1511_v28 = vld [vmem:[%s4211_s4] sm:$0xff] }
 0x15c   :  { %2415 = vmatmul.mubr.msk.f32.vlgmr.msra.gmra.mrb[0].mxu0 %vm913_vm11, %v898_v43  ;;  %2418 = vmatmul.mubr.msk.f32.vlgmr.msra.gmra.mrb[0].mxu1 %vm913_vm11, %v898_v43  ;;  %vm4465_vm11 = vmmov %vm4464_vm5 }
 0x15d   :  { %1585 = vmatprep.mubr.f32.mxu0 %v4279_v18  ;;  %1656 = vmatprep.mubr.f32.mxu1 %v4279_v18 }
 0x22f   :  { %v996_v5 = vpop.f32.mrb[0].mxu0  ;;  %v1067_v7 = vpop.f32.mrb[0].mxu1 }
 0x230   :  { %v997_v3 = vadd.f32 %v996_v5, %v911_v0  ;;  %v998_v11 = vpop.f32.mrb[1].mxu0  ;;  %v1069_v41 = vpop.f32.mrb[1].mxu1  ;;  %v1068_v20 = vadd.f32 %v1067_v7, %v911_v0 }
 0x231   :  { %v999_v17 = vadd.f32 %v998_v11, %v911_v0  ;;  %v1070_v23 = vadd.f32 %v1069_v41, %v911_v0 }
 0x232   :  { %v1072_v4 = vmax.f32 %v997_v3, 0.0  ;;  %v1074_v24 = vmax.f32 %v1068_v20, 0.0 }
 0x233   :  { %v1073_v9 = vmax.f32 %v999_v17, 0.0  ;;  %v1075_v36 = vmax.f32 %v1070_v23, 0.0 }
 0x234   :  { %1080 = vrot.lane.b32.xlu0 %v1072_v4, %s2781_s26 }
 0x235   :  { %1082 = vrot.lane.b32.xlu1 %v1073_v9, %s2781_s26 }
 0x238   :  { %1084 = vrot.lane.b32.xlu0 %v1074_v24, %s2781_s26 }
 0x239   :  { %1086 = vrot.lane.b32.xlu1 %v1075_v36, %s2781_s26 }
 0x2a6   :  { %v1081_v37 = vpop.permute.xlu0 %1080 }
 0x2a7   :  { %v1083_v39 = vpop.permute.xlu1 %1082  ;;  %1097 = vst.msk [vmem:[#allocation2] sm:$0xff] %vm4287_vm15, %v1081_v37  ;;  %vm4470_vm15 = vcmask 1031168  }
 0x2a8   :  { %v3478_v33 = vsel %vm4465_vm11, %v1081_v37, %v1083_v39 }
 0x2aa   :  { %v1085_v52 = vpop.permute.xlu0 %1084 }
 0x2ab   :  { %v1087_v44 = vpop.permute.xlu1 %1086  ;;  %v3472_v31 = vsel %vm4464_vm5, %v1083_v39, %v1085_v52 }
 0x2ac   :  { %1101 = vst.msk [vmem:[#allocation2 + $0x20] sm:$0xff] %vm4463_vm7, %v1087_v44  ;;  %vm4466_vm7 = vmmov %vm4464_vm5  ;;  %vm4467_vm5 = vcmask 1039360  }
 0x2ad   :  { %v3484_v16 = vsel %vm4466_vm7, %v1085_v52, %v1087_v44  ;;  %vm4468_vm11 = vmmov %vm4467_vm5  ;;  %vm4469_vm7 = vcmask 916480  }
 0x2ae   :  { %v3454_v48 = vld [vmem:[#allocation2] sm:$0xff]  ;;  %vm4471_vm0 = vmmov %vm4467_vm5 }
 0x2af   :  { %1184 = vrot.lane.b32.xlu1 %v3454_v48, %s2784_s27  ;;  %1140 = vrot.lane.b32.xlu0 %v3454_v48, %s2782_s0  ;;  %vm4472_vm8 = vmmov %vm4471_vm0 }
 0x2b3   :  { %1272 = vrot.lane.b32.xlu1 %v3454_v48, %s2786_s29  ;;  %1228 = vrot.lane.b32.xlu0 %v3454_v48, %s2785_s28  ;;  %v1126_v50 = vld [vmem:[#allocation2 + $0x20] sm:$0xff] }
 0x2b7   :  { %1360 = vrot.lane.b32.xlu1 %v3454_v48, %s2788_s8  ;;  %1316 = vrot.lane.b32.xlu0 %v3454_v48, %s2787_s30 }
 0x2bb   :  { %1148 = vrot.lane.b32.xlu1 %v1126_v50, %s2782_s0  ;;  %1404 = vrot.lane.b32.xlu0 %v3454_v48, %s2789_s9 }
 0x2bf   :  { %1192 = vrot.lane.b32.xlu0 %v1126_v50, %s2784_s27  ;;  %1144 = vrot.lane.b32.xlu1 %v3472_v31, %s2782_s0 }
 0x2c3   :  { %1236 = vrot.lane.b32.xlu0 %v1126_v50, %s2785_s28  ;;  %1186 = vrot.lane.b32.xlu1 %v3478_v33, %s2784_s27 }
 0x2c7   :  { %1280 = vrot.lane.b32.xlu0 %v1126_v50, %s2786_s29  ;;  %1190 = vrot.lane.b32.xlu1 %v3484_v16, %s2784_s27 }
 0x2cb   :  { %1324 = vrot.lane.b32.xlu0 %v1126_v50, %s2787_s30  ;;  %1230 = vrot.lane.b32.xlu1 %v3478_v33, %s2785_s28 }
 0x2cf   :  { %1368 = vrot.lane.b32.xlu0 %v1126_v50, %s2788_s8  ;;  %1234 = vrot.lane.b32.xlu1 %v3484_v16, %s2785_s28 }
 0x2d3   :  { %1412 = vrot.lane.b32.xlu0 %v1126_v50, %s2789_s9  ;;  %1274 = vrot.lane.b32.xlu1 %v3478_v33, %s2786_s29 }
 0x2d7   :  { %1142 = vrot.lane.b32.xlu0 %v3478_v33, %s2782_s0  ;;  %1278 = vrot.lane.b32.xlu1 %v3484_v16, %s2786_s29 }
 0x2db   :  { %1146 = vrot.lane.b32.xlu0 %v3484_v16, %s2782_s0  ;;  %1318 = vrot.lane.b32.xlu1 %v3478_v33, %s2787_s30 }
 0x2df   :  { %1188 = vrot.lane.b32.xlu0 %v3472_v31, %s2784_s27  ;;  %1322 = vrot.lane.b32.xlu1 %v3484_v16, %s2787_s30 }
 0x2e3   :  { %1232 = vrot.lane.b32.xlu0 %v3472_v31, %s2785_s28  ;;  %1362 = vrot.lane.b32.xlu1 %v3478_v33, %s2788_s8 }
 0x2e7   :  { %1276 = vrot.lane.b32.xlu0 %v3472_v31, %s2786_s29  ;;  %1366 = vrot.lane.b32.xlu1 %v3484_v16, %s2788_s8 }
 0x2eb   :  { %1320 = vrot.lane.b32.xlu0 %v3472_v31, %s2787_s30  ;;  %1406 = vrot.lane.b32.xlu1 %v3478_v33, %s2789_s9 }
 0x2ef   :  { %1364 = vrot.lane.b32.xlu0 %v3472_v31, %s2788_s8  ;;  %1410 = vrot.lane.b32.xlu1 %v3484_v16, %s2789_s9 }
 0x2f3   :  { %1408 = vrot.lane.b32.xlu0 %v3472_v31, %s2789_s9  ;;  %1450 = vrot.lane.b32.xlu1 %v3478_v33, %s2790_s10 }
 0x2f7   :  { %1452 = vrot.lane.b32.xlu0 %v3472_v31, %s2790_s10  ;;  %1454 = vrot.lane.b32.xlu1 %v3484_v16, %s2790_s10 }
 0x2fb   :  { %1456 = vrot.lane.b32.xlu0 %v1126_v50, %s2790_s10  ;;  %1448 = vrot.lane.b32.xlu1 %v3454_v48, %s2790_s10 }
 0x2ff   :  { %1514 = vperm.xlu0 %2648, %v1511_v28  }
 0x321   :  { %v1185_v58 = vpop.permute.xlu1 %1184  ;;  %v1141_v13 = vpop.permute.xlu0 %1140 }
 0x325   :  { %v3540_v61 = vpop.permute.xlu1 %1272  ;;  %v1229_v43 = vpop.permute.xlu0 %1228 }
 0x329   :  { %v3542_v0 = vpop.permute.xlu1 %1360  ;;  %v1317_v5 = vpop.permute.xlu0 %1316 }
 0x32d   :  { %v1149_v7 = vpop.permute.xlu1 %1148  ;;  %v3544_v3 = vpop.permute.xlu0 %1404 }
 0x331   :  { %v1145_v11 = vpop.permute.xlu1 %1144  ;;  %v1193_v41 = vpop.permute.xlu0 %1192 }
 0x335   :  { %v1187_v17 = vpop.permute.xlu1 %1186  ;;  %v1237_v4 = vpop.permute.xlu0 %1236 }
 0x339   :  { %v1191_v20 = vpop.permute.xlu1 %1190  ;;  %v1281_v9 = vpop.permute.xlu0 %1280 }
 0x33a   :  { %v1197_v47 = vsel %vm4470_vm15, %v1191_v20, %v1193_v41  ;;  %vm4475_vm15 = vnez %v4356_v45 }
 0x33d   :  { %v1231_v23 = vpop.permute.xlu1 %1230  ;;  %v1325_v24 = vpop.permute.xlu0 %1324 }
 0x341   :  { %v1235_v36 = vpop.permute.xlu1 %1234  ;;  %v3546_v37 = vpop.permute.xlu0 %1368 }
 0x342   :  { %v1241_v29 = vsel %vm4469_vm7, %v1235_v36, %v1237_v4 }
 0x345   :  { %v1275_v39 = vpop.permute.xlu1 %1274  ;;  %v3548_v44 = vpop.permute.xlu0 %1412 }
 0x349   :  { %v1279_v50 = vpop.permute.xlu1 %1278  ;;  %v1143_v52 = vpop.permute.xlu0 %1142 }
 0x34a   :  { %v1150_v28 = vsel %vm4467_vm5, %v1141_v13, %v1143_v52  ;;  %v1151_v18 = vsel %vm4468_vm11, %v1143_v52, %v1145_v11  ;;  %vm4474_vm5 = vnez %v4360_v51  ;;  %vm4477_vm11 = vnez %v4366_v60 }
 0x34b   :  { %v2654_v21 = vpack.c.bf16 %v1151_v18, %v3478_v33 }
 0x34d   :  { %v1319_v63 = vpop.permute.xlu1 %1318  ;;  %v1147_v46 = vpop.permute.xlu0 %1146  ;;  %2655 = vmatprep.subr.msk.bf16.mxu0 %vm4304_vm9, %v2654_v21  ;;  %vm4478_vm9 = vcmask 916480  }
 0x34e   :  { %v1152_v25 = vsel %vm4471_vm0, %v1145_v11, %v1147_v46  ;;  %v1153_v54 = vsel %vm4472_vm8, %v1147_v46, %v1149_v7  ;;  %vm4306_vm0 = vmpackc.low %vm4475_vm15, %vm4474_vm5  ;;  %v2657_v46 = vpack.c.bf16 %v1150_v28, %v3454_v48  ;;  %vm4476_vm8 = vnez %v4370_v15 }
 0x34f   :  { %vm4311_vm7 = vmpackc.low %vm4477_vm11, %vm4476_vm8  ;;  %v2660_v21 = vpack.c.bf16 %v1153_v54, %v3484_v16  ;;  %v1238_v48 = vsel %vm4478_vm9, %v1229_v43, %v1231_v23  ;;  %vm4481_vm15 = vnez %v4362_v55  ;;  %v2663_v7 = vpack.c.bf16 %v1152_v25, %v3472_v31 }
 0x350   :  { %2658 = vmatpush1.bf16.msk.msra.mxu0 %vm4306_vm0, %v2657_v46  ;;  %vm4480_vm0 = vnez %v4368_v2  ;;  %vm4484_vm9 = vnez %v4380_v35  ;;  %v2666_v43 = vpack.c.bf16 %v1241_v29, %v1197_v47  ;;  %vm4486_vm8 = vmmov %vm4482_vm4 }
 0x351   :  { %v1323_v18 = vpop.permute.xlu1 %1322  ;;  %v1189_v33 = vpop.permute.xlu0 %1188  ;;  %2661 = vmatprep.subr.msk.bf16.mxu1 %vm4311_vm7, %v2660_v21  ;;  %vm4315_vm5 = vmpackc.low %vm4481_vm15, %vm4480_vm0  ;;  %v1194_v25 = vsel %vm4486_vm8, %v1185_v58, %v1187_v17  ;;  %vm4487_vm15 = vcmask 908288   ;;  %vm4491_vm0 = vnez %v4389_v57  ;;  %vm4493_vm8 = vnez %v4399_v8 }
 0x352   :  { %v1329_v13 = vsel %vm4479_vm3, %v1323_v18, %v1325_v24  ;;  %2664 = vmatpush1.bf16.msk.msra.mxu1 %vm4315_vm5, %v2663_v7  ;;  %v1195_v54 = vsel %vm4482_vm4, %v1187_v17, %v1189_v33  ;;  %vm4483_vm7 = vmmov %vm4482_vm4  ;;  %vm4485_vm3 = vnez %v4402_v14  ;;  %v1285_v31 = vsel %vm4487_vm15, %v1279_v50, %v1281_v9 }
 0x353   :  { %v1196_v16 = vsel %vm4483_vm7, %v1189_v33, %v1191_v20  ;;  %vm4319_vm11 = vmpackc.low %vm4485_vm3, %vm4484_vm9  ;;  %vm4488_vm4 = vcmask 916480   ;;  %vm4490_vm5 = vnez %v4376_v40  ;;  %vm4492_vm15 = vnez %v4378_v27 }
 0x354   :  { %2667 = vmatprep.subr.msk.bf16.mxu1 %vm4319_vm11, %v2666_v43  ;;  %vm4489_vm7 = vmmov %vm4488_vm4  ;;  %vm4495_vm11 = vnez %v4374_v34  ;;  %vm4496_vm9 = vnez %v4396_v30  ;;  %v2675_v17 = vpack.c.bf16 %v1238_v48, %v1194_v25  ;;  %v2678_v9 = vpack.c.bf16 %v1329_v13, %v1285_v31 }
 0x355   :  { %v1363_v11 = vpop.permute.xlu1 %1362  ;;  %v1233_v41 = vpop.permute.xlu0 %1232  ;;  %vm4322_vm1 = vmpackc.low %vm4491_vm0, %vm4490_vm5 }
 0x356   :  { %v1239_v4 = vsel %vm4488_vm4, %v1231_v23, %v1233_v41  ;;  %v1240_v20 = vsel %vm4489_vm7, %v1233_v41, %v1235_v36  ;;  %vm4323_vm4 = vmpackc.low %vm4493_vm8, %vm4492_vm15  ;;  %vm4494_vm7 = vcmask 900096  }
 0x357   :  { %v2669_v47 = vpack.c.bf16 %v1239_v4, %v1195_v54  ;;  %v2672_v29 = vpack.c.bf16 %v1240_v20, %v1196_v16  ;;  %v1326_v58 = vsel %vm4494_vm7, %v1317_v5, %v1319_v63  ;;  %vm4325_vm5 = vmpackc.low %vm4496_vm9, %vm4495_vm11  ;;  %vm4497_vm7 = vcmask 908288   ;;  %v4516_v20 = vld [vmem:[#allocation9_spill] sm:$0xff] }
 0x358   :  { %vm4502_vm9 = vcmask 785408  }
 0x359   :  { %v1367_v24 = vpop.permute.xlu1 %1366  ;;  %v1277_v52 = vpop.permute.xlu0 %1276  ;;  %2670 = vmatprep.subr.msk.bf16.mxu0 %vm4322_vm1, %v2669_v47  ;;  %2673 = vmatpush1.bf16.msk.msra.mxu1 %vm4323_vm4, %v2672_v29  ;;  %vm4328_vm1 = vmpackc.low %vm3278_vm12, %vm3182_vm13  ;;  %v4520_v47 = vld [vmem:[#allocation7_spill] sm:$0xff] }
 0x35a   :  { %2676 = vmatpush1.bf16.msk.msra.mxu0 %vm4325_vm5, %v2675_v17  ;;  %2679 = vmatprep.subr.msk.bf16.mxu1 %vm4328_vm1, %v2678_v9  ;;  %v1283_v5 = vsel %vm4497_vm7, %v1275_v39, %v1277_v52  ;;  %vm4498_vm4 = vmmov %vm4497_vm7  ;;  %vm4500_vm5 = vcmask 900096   ;;  %v1373_v48 = vsel %vm4502_vm9, %v1367_v24, %v3546_v37  ;;  %vm4503_vm1 = vcmask 777216  }
 0x35b   :  { %v1284_v23 = vsel %vm4498_vm4, %v1277_v52, %v1279_v50  ;;  %vm4499_vm15 = vmmov %vm4498_vm4  ;;  %vm4504_vm7 = vnez %v4384_v53  ;;  %vm4505_vm4 = vnez %v4408_v12  ;;  %v4518_v52 = vld [vmem:[#allocation8_spill] sm:$0xff] }
 0x35c   :  { %v1282_v36 = vsel %vm4499_vm15, %v3540_v61, %v1275_v39  ;;  %vm4501_vm11 = vmmov %vm4500_vm5  ;;  %vm4508_vm15 = vnez %v4386_v56 }
 0x35d   :  { %v1407_v28 = vpop.permute.xlu1 %1406  ;;  %v1321_v46 = vpop.permute.xlu0 %1320  ;;  %vm4331_vm13 = vmpackc.low %vm4505_vm4, %vm4504_vm7  ;;  %vm4509_vm7 = vnez %v4405_v22  ;;  %v2687_v39 = vpack.c.bf16 %v1326_v58, %v1282_v36  ;;  %vm4510_vm4 = vcmask 785408   ;;  %v4522_v58 = vld [vmem:[#allocation12_spill] sm:$0xff] }
 0x35e   :  { %v1327_v33 = vsel %vm4500_vm5, %v1319_v63, %v1321_v46  ;;  %v1328_v21 = vsel %vm4501_vm11, %v1321_v46, %v1323_v18  ;;  %vm4506_vm5 = vnez %v4391_v62  ;;  %vm4507_vm11 = vnez %v4411_v26  ;;  %vm4511_vm12 = vmmov %vm4510_vm4  ;;  %v4527_v46 = vld [vmem:[#allocation11_spill] sm:$0xff] }
 0x35f   :  { %v2681_v61 = vpack.c.bf16 %v1327_v33, %v1283_v5  ;;  %vm4334_vm9 = vmpackc.low %vm4507_vm11, %vm4506_vm5  ;;  %v2684_v63 = vpack.c.bf16 %v1328_v21, %v1284_v23  ;;  %v1414_v37 = vsel %vm4503_vm1, %v3544_v3, %v1407_v28  ;;  %v4529_v33 = vld [vmem:[#allocation14_spill] sm:$0xff]  ;;  %v4531_v21 = vld [vmem:[#allocation13_spill] sm:$0xff] }
 0x360   :  { %vm4513_vm5 = vmmov %vm4503_vm1 }
 0x361   :  { %v1411_v13 = vpop.permute.xlu1 %1410  ;;  %v1365_v7 = vpop.permute.xlu0 %1364  ;;  %2682 = vmatprep.subr.msk.bf16.mxu0 %vm4331_vm13, %v2681_v61  ;;  %2685 = vmatpush1.bf16.msk.msra.mxu1 %vm4334_vm9, %v2684_v63  ;;  %vm4338_vm13 = vmpackc.low %vm4509_vm7, %vm4508_vm15  ;;  %vm4555_vm15 = vcmask 900096  }
 0x362   :  { %v1417_v54 = vsel %vm4503_vm1, %v1411_v13, %v3548_v44  ;;  %2688 = vmatpush1.bf16.msk.msra.mxu0 %vm4338_vm13, %v2687_v39  ;;  %v1371_v44 = vsel %vm4510_vm4, %v1363_v11, %v1365_v7  ;;  %v1372_v50 = vsel %vm4511_vm12, %v1365_v7, %v1367_v24  ;;  %vm4512_vm9 = vmmov %vm4510_vm4  ;;  %vm4514_vm12 = vcmask 769024  }
 0x363   :  { %v1370_v18 = vsel %vm4512_vm9, %v3542_v0, %v1363_v11  ;;  %vm4337_vm11 = vmpackc.low %vm3323_vm14, %vm3347_vm2  ;;  %v2690_v31 = vpack.c.bf16 %v1417_v54, %v1373_v48  ;;  %vm4517_vm9 = vnez %v4516_v20  ;;  %v4533_v48 = vmov 0.0  }
 0x364   :  { %vm4339_vm4 = vmpackc.low %vm3292_vm6, %vm3315_vm10  ;;  %v2699_v29 = vpack.c.bf16 %v1414_v37, %v1370_v18  ;;  %vm4524_vm10 = vcmask 769024   ;;  %vm4528_vm6 = vnez %v4527_v46  ;;  %vm4552_vm14 = vnez %v4358_v49 }
 0x365   :  { %v1451_v3 = vpop.permute.xlu1 %1450  ;;  %v1409_v16 = vpop.permute.xlu0 %1408  ;;  %2691 = vmatprep.subr.msk.bf16.mxu1 %vm4337_vm11, %v2690_v31  ;;  %vm4521_vm11 = vnez %v4520_v47 }
 0x366   :  { %v1415_v43 = vsel %vm4503_vm1, %v1407_v28, %v1409_v16  ;;  %v1416_v25 = vsel %vm4513_vm5, %v1409_v16, %v1411_v13  ;;  %vm4515_vm5 = vnez %v4438_v19  ;;  %v1474_v28 = vld [vmem:[%s4210_s3] sm:$0xff] }
 0x367   :  { %v2693_v4 = vpack.c.bf16 %v1415_v43, %v1371_v44  ;;  %vm4341_vm1 = vmpackc.low %vm4517_vm9, %vm4515_vm5  ;;  %v2696_v24 = vpack.c.bf16 %v1416_v25, %v1372_v50  ;;  %vm4346_vm9 = vcmask 588800  }
 0x369   :  { %v1455_v41 = vpop.permute.xlu1 %1454  ;;  %v1453_v0 = vpop.permute.xlu0 %1452  ;;  %2694 = vmatprep.subr.msk.bf16.mxu0 %vm4339_vm4, %v2693_v4  ;;  %2697 = vmatpush1.bf16.msk.msra.mxu1 %vm4341_vm1, %v2696_v24  ;;  %vm4523_vm4 = vnez %v4522_v58  ;;  %vm4525_vm1 = vmmov %vm4524_vm10 }
 0x36a   :  { %v1459_v11 = vsel %vm4514_vm12, %v1451_v3, %v1453_v0  ;;  %vm4519_vm12 = vnez %v4518_v52  ;;  %v1460_v17 = vsel %vm4524_vm10, %v1453_v0, %v1455_v41  ;;  %vm4526_vm5 = vmmov %vm4525_vm1  ;;  %vm4532_vm10 = vnez %v4531_v21 }
 0x36b   :  { %vm4345_vm13 = vmpackc.low %vm4521_vm11, %vm4519_vm12  ;;  %vm4547_vm11 = vcmask 908288  }
 0x36c   :  { %2700 = vmatpush1.bf16.msk.msra.mxu0 %vm4345_vm13, %v2699_v29  ;;  %vm4530_vm13 = vnez %v4529_v33 }
 0x36d   :  { %2701 = vmatprep.subr.msk.mxu0 %vm4523_vm4, %v1459_v11  ;;  %v1449_v9 = vpop.permute.xlu1 %1448  ;;  %v1457_v5 = vpop.permute.xlu0 %1456  ;;  %vm4545_vm4 = vcmask 916480  }
 0x36e   :  { %v1458_v23 = vsel %vm4525_vm1, %v1449_v9, %v1451_v3  ;;  %v1461_v36 = vsel %vm4526_vm5, %v1455_v41, %v1457_v5  ;;  %vm4534_vm5 = vcmask 1047688   ;;  %vm4535_vm1 = vcmask 138240   ;;  %vm4546_vm12 = vmmov %vm4545_vm4 }
 0x36f   :  { %2703 = vmatprep.subr.msk.mxu1 %vm4530_vm13, %v1461_v36  ;;  %vm4538_vm13 = vnez %v4368_v2 }
 0x370   :  { %2702 = vmatpush1.msk.msra.mxu0 %vm4528_vm6, %v1458_v23  ;;  %2704 = vmatpush1.msk.msra.mxu1 %vm4532_vm10, %v1460_v17  ;;  %vm4537_vm10 = vnez %v4364_v59  ;;  %vm4542_vm6 = vnez %v4370_v15 }
 0x371   :  { %2419 = vmatmul.mubr.msk.f32.vlgmr.msra.gmra.mrb[2].mxu0 %vm4346_vm9, %v1474_v28  ;;  %2420 = vmatmul.mubr.msk.f32.vlgmr.msra.gmra.mrb[2].mxu1 %vm4346_vm9, %v1474_v28  ;;  %vm4536_vm9 = vmmov %vm4535_vm1 }
 0x372   :  { %2096 = vmatprep.mubr.f32.mxu0 %v4533_v48  ;;  %2167 = vmatprep.mubr.f32.mxu1 %v4533_v48 }
 0x37e   :  { %v1515_v13 = vpop.permute.xlu0 %1514 }
 0x444   :  { %v1587_v7 = vpop.f32.mrb[2].mxu0  ;;  %v1658_v61 = vpop.f32.mrb[2].mxu1 }
 0x445   :  { %v1589_v54 = vpop.f32.mrb[3].mxu0  ;;  %v1588_v63 = vadd.f32 %v1587_v7, %v1515_v13  ;;  %v1659_v37 = vadd.f32 %v1658_v61, %v1515_v13  ;;  %v1660_v39 = vpop.f32.mrb[3].mxu1 }
 0x446   :  { %v1590_v44 = vadd.f32 %v1589_v54, %v1515_v13  ;;  %v1661_v16 = vadd.f32 %v1660_v39, %v1515_v13 }
 0x447   :  { %v1663_v50 = vmax.f32 %v1588_v63, 0.0  ;;  %v1665_v18 = vmax.f32 %v1659_v37, 0.0 }
 0x448   :  { %v1664_v3 = vmax.f32 %v1590_v44, 0.0  ;;  %v1666_v43 = vmax.f32 %v1661_v16, 0.0 }
 0x449   :  { %1671 = vrot.lane.b32.xlu1 %v1663_v50, %s2781_s26  ;;  %1675 = vrot.lane.b32.xlu0 %v1665_v18, %s2781_s26 }
 0x44d   :  { %1673 = vrot.lane.b32.xlu1 %v1664_v3, %s2781_s26 }
 0x451   :  { %1677 = vrot.lane.b32.xlu1 %v1666_v43, %s2781_s26 }
 0x4bb   :  { %v1672_v25 = vpop.permute.xlu1 %1671  ;;  %v1676_v31 = vpop.permute.xlu0 %1675 }
 0x4bc   :  { %1687 = vst.msk [vmem:[#allocation2] sm:$0xff] %vm4534_vm5, %v1672_v25  ;;  %vm4539_vm5 = vmmov %vm4535_vm1 }
 0x4bf   :  { %v1674_v41 = vpop.permute.xlu1 %1673 }
 0x4c0   :  { %v3756_v0 = vsel %vm4535_vm1, %v1672_v25, %v1674_v41  ;;  %v3759_v11 = vsel %vm4536_vm9, %v1674_v41, %v1676_v31  ;;  %vm4540_vm9 = vmmov %vm4535_vm1  ;;  %vm4541_vm1 = vnez %v4360_v51 }
 0x4c1   :  { %1688 = vst [vmem:[#allocation2 + $0x8] sm:$0xff] %v3756_v0  ;;  %1689 = vst [vmem:[#allocation2 + $0x10] sm:$0xff] %v3759_v11  ;;  %v1697_v4 = vsel %vm4537_vm10, %v3756_v0, 0.0  ;;  %v1698_v24 = vsel %vm4538_vm13, %v3759_v11, 0.0 }
 0x4c2   :  { %1701 = vst [vmem:[#allocation3 + $0x8] sm:$0xff] %v1697_v4  ;;  %1702 = vst [vmem:[#allocation3 + $0x10] sm:$0xff] %v1698_v24 }
 0x4c3   :  { %v1678_v29 = vpop.permute.xlu1 %1677  ;;  %v3769_v17 = vld [vmem:[#allocation2] sm:$0xff] }
 0x4c4   :  { %v3772_v9 = vsel %vm4539_vm5, %v1676_v31, %v1678_v29  ;;  %1691 = vst.msk [vmem:[#allocation2 + $0x20] sm:$0xff] %vm4540_vm9, %v1678_v29  ;;  %1750 = vrot.lane.b32.xlu1 %v3769_v17, %s2784_s27  ;;  %1714 = vrot.lane.b32.xlu0 %v3769_v17, %s2782_s0  ;;  %v1696_v5 = vsel %vm4541_vm1, %v3769_v17, 0.0  ;;  %vm4543_vm5 = vcmask 1031168  }
 0x4c5   :  { %1690 = vst [vmem:[#allocation2 + $0x18] sm:$0xff] %v3772_v9  ;;  %1700 = vst [vmem:[#allocation3] sm:$0xff] %v1696_v5  ;;  %v1699_v23 = vsel %vm4542_vm6, %v3772_v9, 0.0 }
 0x4c6   :  { %1703 = vst [vmem:[#allocation3 + $0x18] sm:$0xff] %v1699_v23  ;;  %vm4544_vm9 = vmmov %vm4543_vm5 }
 0x4c8   :  { %1822 = vrot.lane.b32.xlu1 %v3769_v17, %s2786_s29  ;;  %1786 = vrot.lane.b32.xlu0 %v3769_v17, %s2785_s28 }
 0x4cb   :  { %v1708_v36 = vld [vmem:[#allocation2 + $0x20] sm:$0xff] }
 0x4cc   :  { %1894 = vrot.lane.b32.xlu1 %v3769_v17, %s2788_s8  ;;  %1858 = vrot.lane.b32.xlu0 %v3769_v17, %s2787_s30 }
 0x4d0   :  { %1930 = vrot.lane.b32.xlu0 %v3769_v17, %s2789_s9  ;;  %1722 = vrot.lane.b32.xlu1 %v1708_v36, %s2782_s0 }
 0x4d4   :  { %1758 = vrot.lane.b32.xlu0 %v1708_v36, %s2784_s27  ;;  %1718 = vrot.lane.b32.xlu1 %v3759_v11, %s2782_s0 }
 0x4d8   :  { %1794 = vrot.lane.b32.xlu0 %v1708_v36, %s2785_s28  ;;  %1752 = vrot.lane.b32.xlu1 %v3756_v0, %s2784_s27 }
 0x4dc   :  { %1830 = vrot.lane.b32.xlu0 %v1708_v36, %s2786_s29  ;;  %1756 = vrot.lane.b32.xlu1 %v3772_v9, %s2784_s27 }
 0x4e0   :  { %1866 = vrot.lane.b32.xlu0 %v1708_v36, %s2787_s30  ;;  %1788 = vrot.lane.b32.xlu1 %v3756_v0, %s2785_s28 }
 0x4e4   :  { %1902 = vrot.lane.b32.xlu0 %v1708_v36, %s2788_s8  ;;  %1792 = vrot.lane.b32.xlu1 %v3772_v9, %s2785_s28 }
 0x4e8   :  { %1938 = vrot.lane.b32.xlu0 %v1708_v36, %s2789_s9  ;;  %1824 = vrot.lane.b32.xlu1 %v3756_v0, %s2786_s29 }
 0x4ec   :  { %1716 = vrot.lane.b32.xlu0 %v3756_v0, %s2782_s0  ;;  %1828 = vrot.lane.b32.xlu1 %v3772_v9, %s2786_s29 }
 0x4f0   :  { %1860 = vrot.lane.b32.xlu1 %v3756_v0, %s2787_s30  ;;  %1720 = vrot.lane.b32.xlu0 %v3772_v9, %s2782_s0 }
 0x4f4   :  { %1864 = vrot.lane.b32.xlu1 %v3772_v9, %s2787_s30  ;;  %1754 = vrot.lane.b32.xlu0 %v3759_v11, %s2784_s27 }
 0x4f8   :  { %1896 = vrot.lane.b32.xlu1 %v3756_v0, %s2788_s8  ;;  %1790 = vrot.lane.b32.xlu0 %v3759_v11, %s2785_s28 }
 0x4fc   :  { %1900 = vrot.lane.b32.xlu1 %v3772_v9, %s2788_s8  ;;  %1826 = vrot.lane.b32.xlu0 %v3759_v11, %s2786_s29 }
 0x500   :  { %1932 = vrot.lane.b32.xlu1 %v3756_v0, %s2789_s9  ;;  %1862 = vrot.lane.b32.xlu0 %v3759_v11, %s2787_s30 }
 0x504   :  { %1936 = vrot.lane.b32.xlu1 %v3772_v9, %s2789_s9  ;;  %1898 = vrot.lane.b32.xlu0 %v3759_v11, %s2788_s8 }
 0x508   :  { %1968 = vrot.lane.b32.xlu1 %v3756_v0, %s2790_s10  ;;  %1934 = vrot.lane.b32.xlu0 %v3759_v11, %s2789_s9 }
 0x50c   :  { %1972 = vrot.lane.b32.xlu1 %v3772_v9, %s2790_s10  ;;  %1970 = vrot.lane.b32.xlu0 %v3759_v11, %s2790_s10 }
 0x510   :  { %1966 = vrot.lane.b32.xlu1 %v3769_v17, %s2790_s10  ;;  %1974 = vrot.lane.b32.xlu0 %v1708_v36, %s2790_s10 }
 0x536   :  { %v1715_v28 = vpop.permute.xlu0 %1714  ;;  %v1751_v48 = vpop.permute.xlu1 %1750 }
 0x53a   :  { %v1787_v13 = vpop.permute.xlu0 %1786  ;;  %v1823_v7 = vpop.permute.xlu1 %1822 }
 0x53e   :  { %v1859_v54 = vpop.permute.xlu0 %1858  ;;  %v1895_v61 = vpop.permute.xlu1 %1894 }
 0x542   :  { %v3854_v63 = vpop.permute.xlu0 %1930  ;;  %v1723_v37 = vpop.permute.xlu1 %1722 }
 0x546   :  { %v1759_v39 = vpop.permute.xlu0 %1758  ;;  %v1719_v44 = vpop.permute.xlu1 %1718 }
 0x54a   :  { %v1795_v50 = vpop.permute.xlu0 %1794  ;;  %v1753_v18 = vpop.permute.xlu1 %1752 }
 0x54b   :  { %v1760_v3 = vsel %vm4543_vm5, %v1751_v48, %v1753_v18  ;;  %vm4548_vm5 = vcmask 1039360  }
 0x54c   :  { %vm4549_vm2 = vmmov %vm4548_vm5 }
 0x54e   :  { %v1831_v16 = vpop.permute.xlu0 %1830  ;;  %v1757_v43 = vpop.permute.xlu1 %1756 }
 0x54f   :  { %v1763_v25 = vsel %vm4544_vm9, %v1757_v43, %v1759_v39  ;;  %vm4550_vm9 = vmmov %vm4547_vm11 }
 0x552   :  { %v1867_v31 = vpop.permute.xlu0 %1866  ;;  %v1789_v41 = vpop.permute.xlu1 %1788 }
 0x553   :  { %v1796_v4 = vsel %vm4545_vm4, %v1787_v13, %v1789_v41  ;;  %vm4551_vm4 = vnez %v4356_v45 }
 0x556   :  { %v1903_v24 = vpop.permute.xlu0 %1902  ;;  %v1793_v29 = vpop.permute.xlu1 %1792 }
 0x557   :  { %v1799_v5 = vsel %vm4546_vm12, %v1793_v29, %v1795_v50  ;;  %vm4554_vm12 = vmmov %vm4549_vm2 }
 0x558   :  { %v2718_v51 = vpack.c.bf16 %v1799_v5, %v1763_v25  ;;  %v4610_v5 = vld [vmem:[#allocation7_spill] sm:$0xff] }
 0x55a   :  { %v3860_v23 = vpop.permute.xlu0 %1938  ;;  %v1825_v36 = vpop.permute.xlu1 %1824 }
 0x55b   :  { %v3863_v21 = vsel %vm4547_vm11, %v1823_v7, %v1825_v36  ;;  %vm4553_vm11 = vmmov %vm4549_vm2 }
 0x55e   :  { %v1717_v33 = vpop.permute.xlu0 %1716  ;;  %v1829_v48 = vpop.permute.xlu1 %1828 }
 0x55f   :  { %v1724_v46 = vsel %vm4548_vm5, %v1715_v28, %v1717_v33  ;;  %v1725_v39 = vsel %vm4549_vm2, %v1717_v33, %v1719_v44  ;;  %v1835_v58 = vsel %vm4550_vm9, %v1829_v48, %v1831_v16  ;;  %vm4556_vm2 = vmpackc.low %vm4552_vm14, %vm4537_vm10  ;;  %vm4557_vm5 = vnez %v4362_v55 }
 0x560   :  { %v1732_v13 = vsel %vm4551_vm4, %v1724_v46, 0.0  ;;  %v1733_v50 = vsel %vm4552_vm14, %v1725_v39, 0.0  ;;  %v2706_v33 = vpack.c.bf16 %v1725_v39, %v3756_v0  ;;  %vm4558_vm9 = vnez %v4366_v60  ;;  %v2223_v39 = vld [vmem:[%s4213_s6 + $0x188] sm:$0xff] }
 0x561   :  { %1736 = vst [vmem:[#allocation3 + $0x20] sm:$0xff] %v1732_v13  ;;  %1737 = vst [vmem:[#allocation3 + $0x28] sm:$0xff] %v1733_v50  ;;  %vm4560_vm14 = vcmask 1031168   ;;  %v2206_v50 = vld [vmem:[%s4213_s6 + $0x100] sm:$0xff] }
 0x562   :  { %v1721_v52 = vpop.permute.xlu0 %1720  ;;  %v1861_v47 = vpop.permute.xlu1 %1860  ;;  %2707 = vmatprep.subr.msk.bf16.mxu0 %vm4556_vm2, %v2706_v33  ;;  %vm4561_vm10 = vmmov %vm4560_vm14  ;;  %v2207_v33 = vld [vmem:[%s4213_s6 + $0x108] sm:$0xff] }
 0x563   :  { %v1726_v7 = vsel %vm4553_vm11, %v1719_v44, %v1721_v52  ;;  %v1727_v19 = vsel %vm4554_vm12, %v1721_v52, %v1723_v37  ;;  %v1868_v28 = vsel %vm4555_vm15, %v1859_v54, %v1861_v47  ;;  %v2709_v44 = vpack.c.bf16 %v1724_v46, %v3769_v17  ;;  %vm4559_vm15 = vmpackc.low %vm4551_vm4, %vm4541_vm1 }
 0x564   :  { %v1734_v16 = vsel %vm4557_vm5, %v1726_v7, 0.0  ;;  %v1735_v13 = vsel %vm4558_vm9, %v1727_v19, 0.0  ;;  %vm4562_vm11 = vcmask 900096   ;;  %v2712_v37 = vpack.c.bf16 %v1727_v19, %v3772_v9  ;;  %vm4563_vm12 = vmpackc.low %vm4558_vm9, %vm4542_vm6 }
 0x565   :  { %2710 = vmatpush1.bf16.msk.msra.mxu0 %vm4559_vm15, %v2709_v44  ;;  %1738 = vst [vmem:[#allocation3 + $0x30] sm:$0xff] %v1734_v16  ;;  %1739 = vst [vmem:[#allocation3 + $0x38] sm:$0xff] %v1735_v13  ;;  %v2715_v45 = vpack.c.bf16 %v1726_v7, %v3759_v11  ;;  %vm4565_vm4 = vnez %v4380_v35  ;;  %vm4567_vm15 = vcmask 916480   ;;  %vm4569_vm9 = vcmask 785408   ;;  %v2192_v16 = vld [vmem:[%s4213_s6 + $0x90] sm:$0xff]  ;;  %v2193_v13 = vld [vmem:[%s4213_s6 + $0x98] sm:$0xff] }
 0x566   :  { %v1755_v49 = vpop.permute.xlu0 %1754  ;;  %v1865_v59 = vpop.permute.xlu1 %1864  ;;  %2713 = vmatprep.subr.msk.bf16.mxu1 %vm4563_vm12, %v2712_v37  ;;  %vm4564_vm1 = vmpackc.low %vm4557_vm5, %vm4538_vm13 }
 0x567   :  { %v1761_v52 = vsel %vm4560_vm14, %v1753_v18, %v1755_v49  ;;  %v1762_v0 = vsel %vm4561_vm10, %v1755_v49, %v1757_v43  ;;  %v1871_v54 = vsel %vm4562_vm11, %v1865_v59, %v1867_v31  ;;  %2716 = vmatpush1.bf16.msk.msra.mxu1 %vm4564_vm1, %v2715_v45  ;;  %vm4566_vm2 = vmpackc.low %vm4485_vm3, %vm4565_vm4  ;;  %vm4570_vm14 = vcmask 908288  }
 0x568   :  { %2719 = vmatprep.subr.msk.bf16.mxu1 %vm4566_vm2, %v2718_v51  ;;  %vm4568_vm6 = vmmov %vm4567_vm15  ;;  %vm4573_vm3 = vnez %v4376_v40  ;;  %vm4575_vm11 = vnez %v4378_v27  ;;  %vm4577_vm1 = vnez %v4396_v30  ;;  %vm4578_vm4 = vnez %v4374_v34  ;;  %v4619_v51 = vld [vmem:[#allocation11_spill] sm:$0xff] }
 0x569   :  { %vm4571_vm13 = vmmov %vm4570_vm14  ;;  %v2730_v43 = vpack.c.bf16 %v1871_v54, %v1835_v58  ;;  %v2225_v54 = vld [vmem:[%s4213_s6 + $0x198] sm:$0xff] }
 0x56a   :  { %v1791_v60 = vpop.permute.xlu0 %1790  ;;  %v1897_v19 = vpop.permute.xlu1 %1896  ;;  %vm4572_vm5 = vmmov %vm4569_vm9 }
 0x56b   :  { %v1797_v15 = vsel %vm4567_vm15, %v1789_v41, %v1791_v60  ;;  %v1798_v46 = vsel %vm4568_vm6, %v1791_v60, %v1793_v29  ;;  %v1904_v11 = vsel %vm4569_vm9, %v1895_v61, %v1897_v19  ;;  %vm4574_vm10 = vmpackc.low %vm4491_vm0, %vm4573_vm3  ;;  %v2727_v61 = vpack.c.bf16 %v1796_v4, %v1760_v3  ;;  %v4621_v60 = vld [vmem:[#allocation14_spill] sm:$0xff] }
 0x56c   :  { %v2721_v18 = vpack.c.bf16 %v1797_v15, %v1761_v52  ;;  %v2724_v35 = vpack.c.bf16 %v1798_v46, %v1762_v0  ;;  %vm4576_vm12 = vmpackc.low %vm4493_vm8, %vm4575_vm11  ;;  %vm4580_vm15 = vnez %v4416_v42  ;;  %vm4581_vm0 = vnez %v4393_v6  ;;  %v2224_v0 = vld [vmem:[%s4213_s6 + $0x190] sm:$0xff] }
 0x56d   :  { %vm4579_vm2 = vmpackc.low %vm4577_vm1, %vm4578_vm4  ;;  %vm4583_vm9 = vcmask 900096   ;;  %vm4589_vm11 = vnez %v4384_v53  ;;  %vm4591_vm1 = vnez %v4411_v26  ;;  %vm4592_vm4 = vnez %v4391_v62  ;;  %v2176_v46 = vld [vmem:[%s4213_s6 + $0x10] sm:$0xff] }
 0x56e   :  { %v1827_v55 = vpop.permute.xlu0 %1826  ;;  %v1901_v17 = vpop.permute.xlu1 %1900  ;;  %2722 = vmatprep.subr.msk.bf16.mxu0 %vm4574_vm10, %v2721_v18  ;;  %2725 = vmatpush1.bf16.msk.msra.mxu1 %vm4576_vm12, %v2724_v35  ;;  %vm4582_vm6 = vmpackc.low %vm4580_vm15, %vm4581_vm0  ;;  %vm4588_vm10 = vnez %v4408_v12  ;;  %vm4594_vm15 = vnez %v4386_v56  ;;  %v2573_v15 = vpack.c.bf16 %v2193_v13, %v2192_v16  ;;  %v2195_v18 = vld [vmem:[%s4213_s6 + $0xa8] sm:$0xff]  ;;  %v2226_v35 = vld [vmem:[%s4213_s6 + $0x1a0] sm:$0xff] }
 0x56f   :  { %v1833_v2 = vsel %vm4570_vm14, %v1825_v36, %v1827_v55  ;;  %v1834_v9 = vsel %vm4571_vm13, %v1827_v55, %v1829_v48  ;;  %v1907_v14 = vsel %vm4572_vm5, %v1901_v17, %v1903_v24  ;;  %2728 = vmatpush1.bf16.msk.msra.mxu0 %vm4579_vm2, %v2727_v61  ;;  %2731 = vmatprep.subr.msk.bf16.mxu1 %vm4582_vm6, %v2730_v43  ;;  %vm4584_vm8 = vmmov %vm4583_vm9  ;;  %vm4585_vm14 = vcmask 777216   ;;  %v4615_v36 = vld [vmem:[#allocation12_spill] sm:$0xff]  ;;  %v2222_v48 = vld [vmem:[%s4213_s6 + $0x180] sm:$0xff] }
 0x570   :  { %vm4586_vm13 = vmmov %vm4572_vm5  ;;  %v2601_v45 = vpack.c.bf16 %v2223_v39, %v2222_v48  ;;  %v2208_v55 = vld [vmem:[%s4213_s6 + $0x110] sm:$0xff]  ;;  %v2227_v61 = vld [vmem:[%s4213_s6 + $0x1a8] sm:$0xff] }
 0x571   :  { %vm4587_vm3 = vmmov %vm4585_vm14  ;;  %v2232_v48 = vld [vmem:[%s4213_s6 + $0x1d0] sm:$0xff]  ;;  %v2233_v39 = vld [vmem:[%s4213_s6 + $0x1d8] sm:$0xff] }
 0x572   :  { %v1863_v40 = vpop.permute.xlu0 %1862  ;;  %v1933_v57 = vpop.permute.xlu1 %1932  ;;  %vm4590_vm12 = vmpackc.low %vm4588_vm10, %vm4589_vm11  ;;  %vm4604_vm10 = vnez %v4430_v38  ;;  %v2174_v38 = vld [vmem:[%s4213_s6] sm:$0xff]  ;;  %v2185_v16 = vld [vmem:[%s4213_s6 + $0x58] sm:$0xff] }
 0x573   :  { %v1869_v27 = vsel %vm4583_vm9, %v1861_v47, %v1863_v40  ;;  %v1870_v8 = vsel %vm4584_vm8, %v1863_v40, %v1865_v59  ;;  %v1940_v30 = vsel %vm4585_vm14, %v3854_v63, %v1933_v57  ;;  %vm4593_vm2 = vmpackc.low %vm4591_vm1, %vm4592_vm4  ;;  %v2739_v63 = vpack.c.bf16 %v1868_v28, %v3863_v21  ;;  %v1992_v59 = vld [vmem:[%s4212_s5] sm:$0x3]  ;;  %v2216_v13 = vld [vmem:[%s4213_s6 + $0x150] sm:$0xff] }
 0x574   :  { %v2733_v42 = vpack.c.bf16 %v1869_v27, %v1833_v2  ;;  %v2736_v47 = vpack.c.bf16 %v1870_v8, %v1834_v9  ;;  %vm4595_vm0 = vmpackc.low %vm4509_vm7, %vm4594_vm15  ;;  %vm4598_vm8 = vnez %v4435_v10  ;;  %vm4599_vm14 = vnez %v4442_v32  ;;  %v4607_v10 = vld [vmem:[#allocation10_spill] sm:$0xff]  ;;  %v2209_v9 = vld [vmem:[%s4213_s6 + $0x118] sm:$0xff] }
 0x575   :  { %vm4596_vm6 = vmmov %vm4587_vm3  ;;  %vm4603_vm7 = vnez %v4422_v1  ;;  %vm4608_vm1 = vnez %v4607_v10  ;;  %v2190_v32 = vld [vmem:[%s4213_s6 + $0x80] sm:$0xff]  ;;  %v2751_v29 = vpack.c.bf16 %v1940_v30, %v1904_v11  ;;  %v2191_v1 = vld [vmem:[%s4213_s6 + $0x88] sm:$0xff]  ;;  %v2605_v2 = vpack.c.bf16 %v2225_v54, %v2224_v0 }
 0x576   :  { %v1899_v3 = vpop.permute.xlu0 %1898  ;;  %v1937_v34 = vpop.permute.xlu1 %1936  ;;  %2734 = vmatprep.subr.msk.bf16.mxu0 %vm4590_vm12, %v2733_v42  ;;  %2737 = vmatpush1.bf16.msk.msra.mxu1 %vm4593_vm2, %v2736_v47  ;;  %vm4597_vm9 = vmmov %vm4587_vm3  ;;  %vm4606_vm12 = vnez %v4516_v20  ;;  %vm4611_vm2 = vnez %v4610_v5  ;;  %v2175_v20 = vld [vmem:[%s4213_s6 + $0x8] sm:$0xff]  ;;  %v2569_v52 = vpack.c.bf16 %v2191_v1, %v2190_v32  ;;  %v2177_v11 = vld [vmem:[%s4213_s6 + $0x18] sm:$0xff]  ;;  %v2607_v40 = vpack.c.bf16 %v2209_v9, %v2208_v55 }
 0x577   :  { %v1905_v25 = vsel %vm4586_vm13, %v1897_v19, %v1899_v3  ;;  %v1906_v58 = vsel %vm4572_vm5, %v1899_v3, %v1901_v17  ;;  %v1943_v6 = vsel %vm4587_vm3, %v1937_v34, %v3860_v23  ;;  %2740 = vmatpush1.bf16.msk.msra.mxu0 %vm4595_vm0, %v2739_v63  ;;  %vm4600_vm13 = vmpackc.low %vm4598_vm8, %vm4599_vm14  ;;  %vm4601_vm5 = vcmask 769024   ;;  %v4612_v23 = vld [vmem:[#allocation8_spill] sm:$0xff]  ;;  %v4624_v17 = vld [vmem:[#allocation13_spill] sm:$0xff] }
 0x578   :  { %v2742_v4 = vpack.c.bf16 %v1943_v6, %v1907_v14  ;;  %vm4602_vm3 = vmmov %vm4601_vm5  ;;  %vm4613_vm15 = vnez %v4612_v23  ;;  %v2571_v37 = vpack.c.bf16 %v2175_v20, %v2174_v38  ;;  %vm4620_vm14 = vnez %v4619_v51  ;;  %v2194_v14 = vld [vmem:[%s4213_s6 + $0xa0] sm:$0xff]  ;;  %v2179_v8 = vld [vmem:[%s4213_s6 + $0x28] sm:$0xff] }
 0x579   :  { %vm4605_vm11 = vmpackc.low %vm4603_vm7, %vm4604_vm10  ;;  %v2603_v19 = vpack.c.bf16 %v2207_v33, %v2206_v50  ;;  %v2575_v43 = vpack.c.bf16 %v2177_v11, %v2176_v46  ;;  %v2178_v27 = vld [vmem:[%s4213_s6 + $0x20] sm:$0xff]  ;;  %v2609_v3 = vpack.c.bf16 %v2227_v61, %v2226_v35  ;;  %v2228_v6 = vld [vmem:[%s4213_s6 + $0x1b0] sm:$0xff]  ;;  %vm2378_vm10 = vcmask 9216  }
 0x57a   :  { %v1935_v12 = vpop.permute.xlu0 %1934  ;;  %v1969_v31 = vpop.permute.xlu1 %1968  ;;  %2743 = vmatprep.subr.msk.bf16.mxu1 %vm4600_vm13, %v2742_v4  ;;  %vm4609_vm4 = vmpackc.low %vm4606_vm12, %vm4608_vm1  ;;  %vm4622_vm13 = vnez %v4621_v60  ;;  %v2210_v30 = vld [vmem:[%s4213_s6 + $0x120] sm:$0xff]  ;;  %v2229_v42 = vld [vmem:[%s4213_s6 + $0x1b8] sm:$0xff]  ;;  %v2579_v47 = vpack.c.bf16 %v2179_v8, %v2178_v27 }
 0x57b   :  { %v1941_v53 = vsel %vm4596_vm6, %v1933_v57, %v1935_v12  ;;  %v1942_v41 = vsel %vm4597_vm9, %v1935_v12, %v1937_v34  ;;  %vm4614_vm0 = vmpackc.low %vm4611_vm2, %vm4613_vm15  ;;  %vm4616_vm6 = vnez %v4615_v36  ;;  %v2577_v57 = vpack.c.bf16 %v2195_v18, %v2194_v14  ;;  %v2211_v34 = vld [vmem:[%s4213_s6 + $0x128] sm:$0xff]  ;;  %v2214_v23 = vld [vmem:[%s4213_s6 + $0x140] sm:$0xff] }
 0x57c   :  { %v2745_v21 = vpack.c.bf16 %v1941_v53, %v1905_v25  ;;  %v2748_v24 = vpack.c.bf16 %v1942_v41, %v1906_v58  ;;  %vm4617_vm9 = vmmov %vm4602_vm3  ;;  %v2196_v25 = vld [vmem:[%s4213_s6 + $0xb0] sm:$0xff]  ;;  %v2197_v58 = vld [vmem:[%s4213_s6 + $0xb8] sm:$0xff]  ;;  %v2611_v63 = vpack.c.bf16 %v2211_v34, %v2210_v30  ;;  %v2613_v4 = vpack.c.bf16 %v2229_v42, %v2228_v6 }
 0x57d   :  { %vm4618_vm8 = vmmov %vm4602_vm3  ;;  %v2581_v12 = vpack.c.bf16 %v2197_v58, %v2196_v25  ;;  %v2181_v53 = vld [vmem:[%s4213_s6 + $0x38] sm:$0xff]  ;;  %v2212_v41 = vld [vmem:[%s4213_s6 + $0x130] sm:$0xff] }
 0x57e   :  { %v1971_v62 = vpop.permute.xlu0 %1970  ;;  %v1973_v26 = vpop.permute.xlu1 %1972  ;;  %2746 = vmatprep.subr.msk.bf16.mxu0 %vm4605_vm11, %v2745_v21  ;;  %2749 = vmatpush1.bf16.msk.msra.mxu1 %vm4609_vm4, %v2748_v24  ;;  %v2231_v21 = vld [vmem:[%s4213_s6 + $0x1c8] sm:$0xff]  ;;  %v2200_v20 = vld [vmem:[%s4213_s6 + $0xd0] sm:$0xff]  ;;  %v2201_v36 = vld [vmem:[%s4213_s6 + $0xd8] sm:$0xff] }
 0x57f   :  { %v1977_v22 = vsel %vm4601_vm5, %v1969_v31, %v1971_v62  ;;  %v1978_v56 = vsel %vm4602_vm3, %v1971_v62, %v1973_v26  ;;  %2752 = vmatpush1.bf16.msk.msra.mxu0 %vm4614_vm0, %v2751_v29  ;;  %vm4623_vm5 = vcmask 588800   ;;  %vm4625_vm3 = vnez %v4624_v17  ;;  %v2213_v62 = vld [vmem:[%s4213_s6 + $0x138] sm:$0xff]  ;;  %v2182_v29 = vld [vmem:[%s4213_s6 + $0x40] sm:$0xff]  ;;  %v2183_v5 = vld [vmem:[%s4213_s6 + $0x48] sm:$0xff] }
 0x580   :  { %2753 = vmatprep.subr.msk.mxu0 %vm4616_vm6, %v1977_v22  ;;  %vm4626_vm7 = vmmov %vm4623_vm5  ;;  %v2199_v22 = vld [vmem:[%s4213_s6 + $0xc8] sm:$0xff]  ;;  %v2615_v10 = vpack.c.bf16 %v2213_v62, %v2212_v41  ;;  %v2587_v50 = vpack.c.bf16 %v2183_v5, %v2182_v29  ;;  %v2184_v33 = vld [vmem:[%s4213_s6 + $0x50] sm:$0xff] }
 0x581   :  { %v2215_v38 = vld [vmem:[%s4213_s6 + $0x148] sm:$0xff]  ;;  %v2234_v0 = vld [vmem:[%s4213_s6 + $0x1e0] sm:$0xff]  ;;  %v2204_v55 = vld [vmem:[%s4213_s6 + $0xf0] sm:$0xff] }
 0x582   :  { %v1975_v7 = vpop.permute.xlu0 %1974  ;;  %v1967_v28 = vpop.permute.xlu1 %1966  ;;  %v2235_v54 = vld [vmem:[%s4213_s6 + $0x1e8] sm:$0xff]  ;;  %v2186_v60 = vld [vmem:[%s4213_s6 + $0x60] sm:$0xff]  ;;  %v2205_v17 = vld [vmem:[%s4213_s6 + $0xf8] sm:$0xff] }
 0x583   :  { %v1979_v44 = vsel %vm4617_vm9, %v1973_v26, %v1975_v7  ;;  %v1976_v49 = vsel %vm4618_vm8, %v1967_v28, %v1969_v31  ;;  %v2180_v31 = vld [vmem:[%s4213_s6 + $0x30] sm:$0xff]  ;;  %v2198_v26 = vld [vmem:[%s4213_s6 + $0xc0] sm:$0xff]  ;;  %v2619_v7 = vpack.c.bf16 %v2215_v38, %v2214_v23  ;;  %v2589_v28 = vpack.c.bf16 %v2201_v36, %v2200_v20  ;;  %v2219_v11 = vld [vmem:[%s4213_s6 + $0x168] sm:$0xff] }
 0x584   :  { %2754 = vmatpush1.msk.msra.mxu0 %vm4620_vm14, %v1976_v49  ;;  %2755 = vmatprep.subr.msk.mxu1 %vm4622_vm13, %v1979_v44  ;;  %v2583_v24 = vpack.c.bf16 %v2181_v53, %v2180_v31  ;;  %v2585_v32 = vpack.c.bf16 %v2199_v22, %v2198_v26  ;;  %v2621_v44 = vpack.c.bf16 %v2233_v39, %v2232_v48  ;;  %v2217_v49 = vld [vmem:[%s4213_s6 + $0x158] sm:$0xff]  ;;  %v2188_v18 = vld [vmem:[%s4213_s6 + $0x70] sm:$0xff] }
 0x585   :  { %2421 = vmatmul.mubr.msk.f32.vlgmr.msra.gmra.mrb[4].mxu0 %vm4623_vm5, %v1992_v59  ;;  %2756 = vmatpush1.msk.msra.mxu1 %vm4625_vm3, %v1978_v56  ;;  %v2230_v56 = vld [vmem:[%s4213_s6 + $0x1c0] sm:$0xff]  ;;  %v2625_v46 = vpack.c.bf16 %v2235_v54, %v2234_v0  ;;  %v2597_v14 = vpack.c.bf16 %v2205_v17, %v2204_v55  ;;  %v2189_v35 = vld [vmem:[%s4213_s6 + $0x78] sm:$0xff]  ;;  %v2236_v61 = vld [vmem:[%s4213_s6 + $0x1f0] sm:$0xff] }
 0x586   :  { %2422 = vmatmul.mubr.msk.f32.vlgmr.msra.gmra.mrb[4].mxu1 %vm4626_vm7, %v1992_v59  ;;  %2570 = vmatprep.subr.bf16.mxu0 %v2569_v52  ;;  %v2617_v1 = vpack.c.bf16 %v2231_v21, %v2230_v56  ;;  %v2202_v59 = vld [vmem:[%s4213_s6 + $0xe0] sm:$0xff]  ;;  %v2203_v52 = vld [vmem:[%s4213_s6 + $0xe8] sm:$0xff]  ;;  %v2221_v27 = vld [vmem:[%s4213_s6 + $0x178] sm:$0xff] }
 0x587   :  { %2572 = vmatpush3.bf16.msra.mxu0 %v2571_v37  ;;  %2602 = vmatprep.subr.bf16.mxu1 %v2601_v45  ;;  %v2591_v37 = vpack.c.bf16 %v2185_v16, %v2184_v33  ;;  %v2623_v45 = vpack.c.bf16 %v2217_v49, %v2216_v13  ;;  %v2593_v51 = vpack.c.bf16 %v2203_v52, %v2202_v59 }
 0x588   :  { %2604 = vmatpush3.bf16.msra.mxu1 %v2603_v19  ;;  %2574 = vmatprep.subr.bf16.mxu0 %v2573_v15  ;;  %v2187_v19 = vld [vmem:[%s4213_s6 + $0x68] sm:$0xff]  ;;  %v2218_v15 = vld [vmem:[%s4213_s6 + $0x160] sm:$0xff] }
 0x589   :  { %2606 = vmatprep.subr.bf16.mxu1 %v2605_v2  ;;  %v2595_v2 = vpack.c.bf16 %v2187_v19, %v2186_v60  ;;  %v2627_v9 = vpack.c.bf16 %v2219_v11, %v2218_v15 }
 0x58b   :  { %2576 = vmatpush3.bf16.msra.mxu0 %v2575_v43  ;;  %v2599_v43 = vpack.c.bf16 %v2189_v35, %v2188_v18 }
 0x58c   :  { %2608 = vmatpush3.bf16.msra.mxu1 %v2607_v40  ;;  %2578 = vmatprep.subr.bf16.mxu0 %v2577_v57  ;;  %v2237_v40 = vld [vmem:[%s4213_s6 + $0x1f8] sm:$0xff]  ;;  %v2220_v57 = vld [vmem:[%s4213_s6 + $0x170] sm:$0xff]  ;;  %s2794_s6 = smov [#allocation4]  }
 0x58d   :  { %2610 = vmatprep.subr.bf16.mxu1 %v2609_v3  ;;  %v2629_v8 = vpack.c.bf16 %v2237_v40, %v2236_v61  ;;  %v2631_v30 = vpack.c.bf16 %v2221_v27, %v2220_v57  ;;  %s2405_s28 = sshll.u32 %s2794_s6, 4  ;;  %s2406_s28 = int_to_ptr.vmem [resolvable:$true] %s2405_s28 }
 0x58e   :  { %s2757_s29 = scalar_lea.vmem %s2406_s28, 32  ;;  %p2762_p1 = scmp.lt.s32.totalorder %s2406_s28, %s2406_s28 }
 0x58f   :  { %2580 = vmatpush3.bf16.msra.mxu0 %v2579_v47  ;;  %p2758_p0 = scmp.ne.s32.totalorder %s2406_s28, %s2757_s29  ;;  %p2763_p2 = scmp.lt.s32.totalorder %s2757_s29, %s2757_s29 }
 0x590   :  { %2612 = vmatpush3.bf16.msra.mxu1 %v2611_v63  ;;  %2582 = vmatprep.subr.bf16.mxu0 %v2581_v12 }
 0x591   :  { %2614 = vmatprep.subr.bf16.mxu1 %v2613_v4  ;;  %p2764_p3 = por %p2763_p2, %p2762_p1 }
 0x593   :  { %2584 = vmatpush3.bf16.msra.mxu0 %v2583_v24  ;;  %p2765_p4 = pnand %p2764_p3, %p2758_p0 }
 0x594   :  { %2616 = vmatpush3.bf16.msra.mxu1 %v2615_v10  ;;  %2586 = vmatprep.subr.bf16.mxu0 %v2585_v32 }
 0x595   :  { %2618 = vmatprep.subr.bf16.mxu1 %v2617_v1 }
 0x597   :  { %2588 = vmatpush3.bf16.msra.mxu0 %v2587_v50 }
 0x598   :  { %2620 = vmatpush3.bf16.msra.mxu1 %v2619_v7  ;;  %2590 = vmatprep.subr.bf16.mxu0 %v2589_v28 }
 0x599   :  { %2622 = vmatprep.subr.bf16.mxu1 %v2621_v44 }
 0x59b   :  { %2592 = vmatpush3.bf16.msra.mxu0 %v2591_v37 }
 0x59c   :  { %2624 = vmatpush3.bf16.msra.mxu1 %v2623_v45  ;;  %2594 = vmatprep.subr.bf16.mxu0 %v2593_v51 }
 0x59d   :  { %2626 = vmatprep.subr.bf16.mxu1 %v2625_v46 }
 0x59f   :  { %2596 = vmatpush3.bf16.msra.mxu0 %v2595_v2 }
 0x5a0   :  { %2628 = vmatpush3.bf16.msra.mxu1 %v2627_v9  ;;  %2598 = vmatprep.subr.bf16.mxu0 %v2597_v14 }
 0x5a1   :  { %2630 = vmatprep.subr.bf16.mxu1 %v2629_v8 }
 0x5a3   :  { %2600 = vmatpush3.bf16.msra.mxu0 %v2599_v43 }
 0x5a4   :  { %2632 = vmatpush3.bf16.msra.mxu1 %v2631_v30 }
 0x658   :  { %v2098_v3 = vpop.f32.mrb[4].mxu0 }
 0x659   :  { %v2100_v34 = vpop.f32.mrb[5].mxu0  ;;  %v2169_v25 = vpop.f32.mrb[4].mxu1 }
 0x65a   :  { %v2171_v58 = vpop.f32.mrb[5].mxu1  ;;  %2302 = vmatprep.mubr.f32.mxu0 %v2100_v34 }
 0x65b   :  { %2303 = vmatmul.mubr.f32.vlgmr.msra.gmra.mrb[6].mxu0 %v2098_v3  ;;  %2372 = vmatprep.mubr.f32.mxu1 %v2171_v58 }
 0x65c   :  { %2373 = vmatmul.mubr.f32.vlgmr.msra.gmra.mrb[6].mxu1 %v2169_v25 }
 0x72e   :  { %v2455_v6 = vpop.f32.mrb[6].mxu0 }
 0x72f   :  { %v2456_v42 = vpop.f32.mrb[7].mxu0  ;;  %v2490_v47 = vpop.f32.mrb[6].mxu1 }
 0x730   :  { %v2457_v63 = vadd.f32 %v2456_v42, %v2455_v6  ;;  %v2491_v12 = vpop.f32.mrb[7].mxu1 }
 0x731   :  { %v2492_v31 = vadd.f32 %v2491_v12, %v2490_v47 }
 0x733   :  { %v2375_v53 = vadd.f32 %v2492_v31, %v2457_v63 }
 0x735   :  { %v2379_v41 = vsel %vm2378_vm10, %v2375_v53, -inf }
 0x736   :  { %v2380_v4 = vrot.slane %v2379_v41, 4 }
 0x738   :  { %v2381_v62 = vmax.f32 %v2379_v41, %v2380_v4 }
 0x73a   :  { %v2382_v26 = vrot.slane %v2381_v62, 2 }
 0x73c   :  { %v2383_v22 = vmax.f32 %v2381_v62, %v2382_v26 }
 0x73e   :  { %v2384_v56 = vrot.slane %v2383_v22, 1 }
 0x740   :  { %v2385_v21 = vmax.f32 %v2383_v22, %v2384_v56 }
 0x742   :  { %v2386_v24 = vsub.f32 %v2375_v53, %v2385_v21 }
 0x744   :  { %v2387_v10 = vmul.f32 1.442695, %v2386_v24 }
 0x746   :  { %2649 = vpow2.f32 %v2387_v10 }
 0x750   :  { %v2650_v32 = vpop.eup %2649 }
 0x751   :  { %v2389_v29 = vsel %vm2378_vm10, %v2650_v32, 0.0 }
 0x752   :  { %v2390_v5 = vrot.slane %v2389_v29, 4 }
 0x754   :  { %v2391_v23 = vadd.f32 %v2390_v5, %v2389_v29 }
 0x756   :  { %v2392_v1 = vrot.slane %v2391_v23, 2 }
 0x758   :  { %v2393_v38 = vadd.f32 %v2392_v1, %v2391_v23 }
 0x75a   :  { %v2394_v20 = vrot.slane %v2393_v38, 1 }
 0x75c   :  { %v2395_v36 = vadd.f32 %v2394_v20, %v2393_v38 }
 0x75e   :  { %2651 = vrcp.f32 %v2395_v36 }
 0x768   :  { %v2652_v48 = vpop.eup %2651 }
 0x769   :  { %v2397_v39 = vmul.f32 %v2652_v48, %v2650_v32 }
 0x76b   :  { %2398 = vst.msk [vmem:[#allocation4] sm:$0x3] %vm2378_vm10, %v2397_v39 }
 0x76c   :  { %2768 = shalt.err (!%p2765_p4)
}
 0x76d   :  { %s2769_s9 = scalar_lea.hbm %s4214_s7, 32 }
 0x76e   :  { %p2770_p5 = scmp.ne.s32.totalorder %s4214_s7, %s2769_s9  ;;  %p2773_p6 = scmp.lt.u32.totalorder %s2769_s9, %s4214_s7 }
 0x770   :  { %p2775_p7 = pnand %p2773_p6, %p2770_p5 }
 0x772   :  { %2778 = shalt.err (!%p2775_p7)
}
 0x773   :  { %2408 = dma.vmem_to_hbm [thread:$0]  %s2406_s28, 32, %s4214_s7, [#allocation5]  }
 0x774   :  { %2779 = dma.done.wait [#allocation5], 32  }
 0x775   :  { %2780 = vsyncadd [#allocation5], 4294967264 }
 0x776   :  { %2412 = vsyncpa [#allocation5], 1 }

</bundles_post_ra>
